<compile_context>
chip_gen: v6e
topology: v6e:2x2x1
jax: 0.10.0
libtpu: 0.0.40
codegen_flags: <defaults>
</compile_context>

<pallas_src>
import jax
import jax.numpy as jnp
from jax import lax
from jax.experimental import pallas as pl
from jax.experimental.pallas import tpu as pltpu
import numpy as np

LANE = 128
ALIGN_B = 16   # batch-tile alignment (bf16 sublane tile = 16)


def _round_up(v, m):
    return (v + m - 1) // m * m


def segment_attention_kernel(
    # scalar prefetch (SMEM)
    tmax_ref,     # (n_tiles,) i32   per-batch-tile max segment length
    # inputs
    x_ref,        # (T, Bt, I)  bf16 padded segment features, time-major
    len_ref,      # (Bt, 1)     i32  segments per document
    wih_ref,      # (I, 6*Hp)   bf16 [fwd | bwd] input weights, gate blocks lane-aligned
    bih_ref,      # (1, 6*Hp)   f32  [fwd | bwd] input biases
    whh_f_ref,    # (Hp, 3*Hp)  bf16
    whh_b_ref,    # (Hp, 3*Hp)  bf16
    bhh_f_ref,    # (1, 3*Hp)   f32
    bhh_b_ref,    # (1, 3*Hp)   f32
    wa_ref,       # (2*Hp, Ap)  bf16 attention linear weight^T
    ctxw_ref,     # (1, Ap)     f32  context weight (row)
    # outputs
    ctxvec_ref,   # (Bt, 2*Hp)  f32  context vectors (padded hidden layout)
    attw_ref,     # (1, T, Bt)  f32  attention weights, time-major per tile
    # scratch
    gx_ref,       # (T, Bt, 6*Hp) bf16  precomputed input projections
    hseq_ref,     # (T, Bt, 2*Hp) bf16  [fwd | bwd] hidden sequence
):
    T, Bt, I = x_ref.shape
    Hp = whh_f_ref.shape[0]
    H3 = 3 * Hp
    bf16 = jnp.bfloat16

    lens = len_ref[...]                              # (Bt, 1) i32
    tmax = tmax_ref[pl.program_id(0)]                # i32 scalar (SMEM)

    # ---- (1) one big bf16 MXU matmul: input projections for BOTH directions ----
    x2d = x_ref[...].reshape(T * Bt, I)              # already bf16
    gx = jnp.dot(x2d, wih_ref[...], preferred_element_type=jnp.float32) + bih_ref[...]
    gx_ref[...] = gx.reshape(T, Bt, 2 * H3).astype(bf16)

    # hoisted broadcasts / loads (JAX does not CSE broadcast_in_dim inside loops)
    bhh_f = jnp.broadcast_to(bhh_f_ref[...], (Bt, H3))
    bhh_b = jnp.broadcast_to(bhh_b_ref[...], (Bt, H3))
    whh_f = whh_f_ref[...]
    whh_b = whh_b_ref[...]

    def gru_gates(gx_t, gh_t, h):
        # torch gate order r, z, n; gate slices are 128-lane aligned (Hp multiple of 128)
        r = jax.nn.sigmoid(gx_t[:, :Hp] + gh_t[:, :Hp])
        z = jax.nn.sigmoid(gx_t[:, Hp:2 * Hp] + gh_t[:, Hp:2 * Hp])
        n = jnp.tanh(gx_t[:, 2 * Hp:] + r * gh_t[:, 2 * Hp:])
        return n + z * (h - n)                       # == (1 - z) * n + z * h

    # ---- (2) fused fwd/bwd recurrence: two independent chains per iteration ----
    def body(i, carry):
        h_f, h_b = carry
        tf = i                 # forward time index
        tb = tmax - 1 - i      # backward time index (everything >= tmax is padding)

        gx_f = gx_ref[tf, :, :H3]            # (Bt, 3*Hp) bf16 (promotes to f32 on add)
        gx_b = gx_ref[tb, :, H3:]            # (Bt, 3*Hp)

        gh_f = jnp.dot(h_f.astype(bf16), whh_f, preferred_element_type=jnp.float32) + bhh_f
        gh_b = jnp.dot(h_b.astype(bf16), whh_b, preferred_element_type=jnp.float32) + bhh_b

        hf_new = gru_gates(gx_f, gh_f, h_f)
        hb_new = gru_gates(gx_b, gh_b, h_b)

        valid_f = tf < lens                  # (Bt, 1) packed-sequence semantics
        valid_b = tb < lens

        hseq_ref[tf, :, :Hp] = jnp.where(valid_f, hf_new, 0.0).astype(bf16)
        hseq_ref[tb, :, Hp:] = jnp.where(valid_b, hb_new, 0.0).astype(bf16)

        return (jnp.where(valid_f, hf_new, h_f),
                jnp.where(valid_b, hb_new, h_b))

    h0 = jnp.zeros((Bt, Hp), jnp.float32)
    lax.fori_loop(0, tmax, body, (h0, h0))

    # Zero ONLY the [tmax, T) tail (rows < tmax are fully written by the loop).
    # Handles uninitialized VMEM; masked softmax weight is exactly 0 there.
    zero_row = jnp.zeros((Bt, 2 * Hp), bf16)

    def zero_tail(t, c):
        hseq_ref[t] = zero_row
        return c

    lax.fori_loop(tmax, jnp.int32(T), zero_tail, 0)

    # ---- (3) attention: one bf16 matmul, masked softmax over time, weighted sum ----
    h_all = hseq_ref[...]                                            # (T, Bt, 2*Hp) bf16
    flat = h_all.reshape(T * Bt, 2 * Hp)
    proj = jnp.tanh(jnp.dot(flat, wa_ref[...],
                            preferred_element_type=jnp.float32))      # (T*Bt, Ap) f32
    proj3 = proj.reshape(T, Bt, -1)
    sc = jnp.sum(proj3 * ctxw_ref[...].reshape(1, 1, -1), axis=-1)     # (T, Bt)

    t_idx = lax.broadcasted_iota(jnp.int32, (T, Bt), 0)
    valid = t_idx < jnp.transpose(lens)                               # (T, Bt)
    sc = jnp.where(valid, sc, jnp.float32(-1e30))                     # finite: no NaN for len==0

    m = jnp.max(sc, axis=0, keepdims=True)
    e = jnp.exp(sc - m)
    w = e * pl.reciprocal(jnp.sum(e, axis=0, keepdims=True), approx=True)   # (T, Bt)

    ctxvec_ref[...] = jnp.sum(w[:, :, None] * h_all, axis=0)          # (Bt, 2*Hp) f32
    attw_ref[...] = w[None]                                           # (1, T, Bt)


def make_params(key, input_size, hidden_size, attention_size):
    H = hidden_size // 2
    ks = jax.random.split(key, 10)

    def rnd(k, shape, std=0.1):
        return (std * jax.random.normal(k, shape)).astype(jnp.float32)

    return dict(
        wih_f=rnd(ks[0], (3 * H, input_size)),
        whh_f=rnd(ks[1], (3 * H, H)),
        bih_f=rnd(ks[2], (3 * H,)),
        bhh_f=rnd(ks[3], (3 * H,)),
        wih_b=rnd(ks[4], (3 * H, input_size)),
        whh_b=rnd(ks[5], (3 * H, H)),
        bih_b=rnd(ks[6], (3 * H,)),
        bhh_b=rnd(ks[7], (3 * H,)),
        wa=rnd(ks[8], (attention_size, hidden_size)),
        ctxw=rnd(ks[9], (attention_size, 1), std=0.02),   # matches normal_(0, 0.02)
    )


def _pick_vmem_limit_bytes():
    cap = 64 * 1024 * 1024                        # conservative fallback (v7x physical)
    try:
        info = pltpu.get_tpu_info()
        cap = int(getattr(info, "vmem_capacity_bytes", cap))
    except Exception:
        pass
    # ~3/4 of physical: 48 MiB on v7x (64 MiB total), 96 MiB on v5e/v6e (128 MiB total)
    return int(min(cap * 3 // 4, 100 * 1024 * 1024))


def _choose_b_tile(B, requested):
    bt = min(int(requested), _round_up(B, ALIGN_B))
    bt = max(ALIGN_B, _round_up(bt, ALIGN_B))
    # Keep at least 2 batch tiles when the batch allows it (v7x has 2 TensorCores).
    if B <= bt and B > ALIGN_B:
        bt = max(ALIGN_B, _round_up((B + 1) // 2, ALIGN_B))
    return bt


def _vmem_bytes_estimate(T, bt, I, Hp, Ap):
    bf2, f4 = 2, 4
    x_buf = 2 * T * bt * I * bf2                       # double-buffered streamed input
    gx = T * bt * 6 * Hp * bf2                         # bf16 scratch
    hseq = T * bt * 2 * Hp * bf2                       # bf16 scratch
    gx_tmp = T * bt * 6 * Hp * f4                      # transient f32 matmul result
    weights = 2 * (I * 6 * Hp * bf2 + 2 * (Hp * 3 * Hp * bf2) + 2 * Hp * Ap * bf2
                   + 6 * Hp * f4 + 2 * (3 * Hp * f4) + Ap * f4)
    outs = 2 * (bt * 2 * Hp * f4 + T * bt * f4)
    return x_buf + gx + hseq + gx_tmp + weights + outs


def segment_attention_forward(x_padded, lengths, params, *, b_tile=128):
    """x_padded: (B, T, I) f32; lengths: (B,) int. Returns (ctx (B, 2H), weights (B, T))."""
    B, T, I = x_padded.shape
    H = params["whh_f"].shape[1]
    A = params["wa"].shape[0]
    Hp = _round_up(H, LANE)          # lane-aligned per-direction hidden
    Ap = _round_up(A, LANE)          # lane-aligned attention dim
    f32 = jnp.float32
    bf16 = jnp.bfloat16

    vmem_limit = _pick_vmem_limit_bytes()
    b_tile = _choose_b_tile(B, b_tile)
    # Auto-shrink the batch tile until the per-tile footprint fits the VMEM budget
    # (covers v7x's 64 MiB; if T is very long this is where the gx precompute cost lands).
    while b_tile > ALIGN_B and _vmem_bytes_estimate(T, b_tile, I, Hp, Ap) > int(0.8 * vmem_limit):
        b_tile = max(ALIGN_B, _round_up(b_tile // 2, ALIGN_B))

    Bp = _round_up(B, b_tile)
    n_tiles = Bp // b_tile

    # ---- lane-aligned, zero-padded weight layouts (zeros keep padded units at 0) ----
    def pad_gates_cols(wT, rows_real, rows_pad):
        out = jnp.zeros((rows_pad, 3 * Hp), f32)
        for g in range(3):
            out = out.at[:rows_real, g * Hp:g * Hp + H].set(wT[:, g * H:(g + 1) * H])
        return out

    def pad_gates_bias(b):
        out = jnp.zeros((1, 3 * Hp), f32)
        for g in range(3):
            out = out.at[0, g * Hp:g * Hp + H].set(b[g * H:(g + 1) * H])
        return out

    wih_f = pad_gates_cols(params["wih_f"].T.astype(f32), I, I)
    wih_b = pad_gates_cols(params["wih_b"].T.astype(f32), I, I)
    whh_f = pad_gates_cols(params["whh_f"].T.astype(f32), H, Hp).astype(bf16)
    whh_b = pad_gates_cols(params["whh_b"].T.astype(f32), H, Hp).astype(bf16)
    bih_f, bhh_f = pad_gates_bias(params["bih_f"]), pad_gates_bias(params["bhh_f"])
    bih_b, bhh_b = pad_gates_bias(params["bih_b"]), pad_gates_bias(params["bhh_b"])

    wih_comb = jnp.concatenate([wih_f, wih_b], axis=1).astype(bf16)           # (I, 6Hp)
    bih_comb = jnp.concatenate([bih_f, bih_b], axis=1)                        # (1, 6Hp)

    waT = params["wa"].T.astype(f32)                                          # (2H, A)
    wa_pad = jnp.zeros((2 * Hp, Ap), f32)
    wa_pad = wa_pad.at[:H, :A].set(waT[:H]).at[Hp:Hp + H, :A].set(waT[H:])
    wa_pad = wa_pad.astype(bf16)
    ctxw = jnp.zeros((1, Ap), f32).at[0, :A].set(params["ctxw"][:, 0])

    # ---- batch pad + time-major (bf16); per-tile max length for the SMEM prefetch ----
    x_tm = jnp.transpose(x_padded, (1, 0, 2)).astype(bf16)                    # (T, B, I)
    x_tm = jnp.pad(x_tm, ((0, 0), (0, Bp - B), (0, 0)))
    lens_flat = jnp.pad(lengths.astype(jnp.int32), (0, Bp - B))
    tile_max = jnp.minimum(jnp.max(lens_flat.reshape(n_tiles, b_tile), axis=1), T)
    tile_max = tile_max.astype(jnp.int32)
    lens = lens_flat.reshape(Bp, 1)

    H2p = 2 * Hp
    grid_spec = pltpu.PrefetchScalarGridSpec(
        num_scalar_prefetch=1,
        grid=(n_tiles,),
        in_specs=[
            pl.BlockSpec((T, b_tile, I), lambda b, tm: (0, b, 0)),     # x (batch-tiled, bf16)
            pl.BlockSpec((b_tile, 1), lambda b, tm: (b, 0)),           # lengths
            pl.BlockSpec((I, 6 * Hp), lambda b, tm: (0, 0)),           # Wih fwd|bwd (resident)
            pl.BlockSpec((1, 6 * Hp), lambda b, tm: (0, 0)),           # bih fwd|bwd
            pl.BlockSpec((Hp, 3 * Hp), lambda b, tm: (0, 0)),          # Whh fwd (bf16)
            pl.BlockSpec((Hp, 3 * Hp), lambda b, tm: (0, 0)),          # Whh bwd (bf16)
            pl.BlockSpec((1, 3 * Hp), lambda b, tm: (0, 0)),           # bhh fwd
            pl.BlockSpec((1, 3 * Hp), lambda b, tm: (0, 0)),           # bhh bwd
            pl.BlockSpec((H2p, Ap), lambda b, tm: (0, 0)),             # Wa^T (bf16)
            pl.BlockSpec((1, Ap), lambda b, tm: (0, 0)),               # context weight
        ],
        out_specs=(
            pl.BlockSpec((b_tile, H2p), lambda b, tm: (b, 0)),         # context vectors
            pl.BlockSpec((1, T, b_tile), lambda b, tm: (b, 0, 0)),     # attention weights (T, Bt)
        ),
        scratch_shapes=[
            pltpu.VMEM((T, b_tile, 6 * Hp), jnp.bfloat16),             # gx (both directions)
            pltpu.VMEM((T, b_tile, H2p), jnp.bfloat16),                # hseq [fwd | bwd]
        ],
    )

    ctx_pad, attw_tiles = pl.pallas_call(
        segment_attention_kernel,
        out_shape=(jax.ShapeDtypeStruct((Bp, H2p), jnp.float32),
                   jax.ShapeDtypeStruct((n_tiles, T, b_tile), jnp.float32)),
        grid_spec=grid_spec,
        compiler_params=pltpu.CompilerParams(
            dimension_semantics=("parallel",),        # batch tiles -> both v7x TensorCores
            vmem_limit_bytes=vmem_limit,              # ~3/4 physical VMEM per generation
        ),
    )(tile_max, x_tm, lens, wih_comb, bih_comb, whh_f, whh_b, bhh_f, bhh_b, wa_pad, ctxw)

    # strip padding: real fwd hidden is [:H], real bwd hidden is [Hp:Hp+H]
    ctx = jnp.concatenate([ctx_pad[:B, :H], ctx_pad[:B, Hp:Hp + H]], axis=-1)
    attw = jnp.transpose(attw_tiles, (0, 2, 1)).reshape(Bp, T)[:B]
    return ctx, attw


def reference_forward(x_padded, lengths, params):
    """Pure-JAX f32 reference with identical packed-sequence-via-masking semantics."""
    B, T, _ = x_padded.shape
    H = params["whh_f"].shape[1]

    def run_dir(WihT, WhhT, bih, bhh, reverse):
        def step(h, inp):
            x_t, valid = inp
            gx = x_t @ WihT + bih
            gh = h @ WhhT + bhh
            r = jax.nn.sigmoid(gx[:, :H] + gh[:, :H])
            z = jax.nn.sigmoid(gx[:, H:2 * H] + gh[:, H:2 * H])
            n = jnp.tanh(gx[:, 2 * H:] + r * gh[:, 2 * H:])
            h_new = (1.0 - z) * n + z * h
            return jnp.where(valid, h_new, h), jnp.where(valid, h_new, 0.0)

        x_tm = jnp.transpose(x_padded, (1, 0, 2))
        valid_t = (jnp.arange(T)[:, None] < lengths[None, :])[:, :, None]
        _, outs = lax.scan(step, jnp.zeros((B, H), jnp.float32),
                           (x_tm, valid_t), reverse=reverse)
        return outs

    hf = run_dir(params["wih_f"].T, params["whh_f"].T, params["bih_f"], params["bhh_f"], False)
    hb = run_dir(params["wih_b"].T, params["whh_b"].T, params["bih_b"], params["bhh_b"], True)
    h_all = jnp.transpose(jnp.concatenate([hf, hb], -1), (1, 0, 2))   # (B, T, 2H)
    sc = jnp.squeeze(jnp.tanh(h_all @ params["wa"].T) @ params["ctxw"], -1)
    mask = jnp.arange(T)[None, :] >= lengths[:, None]
    sc = jnp.where(mask, -jnp.inf, sc)
    w = jax.nn.softmax(sc, axis=-1)
    ctx = jnp.einsum("bt,bth->bh", w, h_all)
    return ctx, w


if __name__ == "__main__":
    B, T, input_size, hidden_size, attention_size = 2, 8, 32, 32, 16

    key = jax.random.PRNGKey(0)
    k_param, k_x = jax.random.split(key)
    params = make_params(k_param, input_size, hidden_size, attention_size)
    x = jax.random.normal(k_x, (B, T, input_size), jnp.float32)   # padded segments
    lengths = jnp.array([8, 5], jnp.int32)                        # segment_per_document

    ctx, w = segment_attention_forward(x, lengths, params)
    jax.block_until_ready((ctx, w))

    ctx_ref, w_ref = reference_forward(x, lengths, params)
    # tolerance accounts for bf16 MXU operands (x, Wih, Whh, hseq, Wa) on all matmuls
    np.testing.assert_allclose(np.asarray(ctx), np.asarray(ctx_ref), rtol=2e-2, atol=2e-2)
    np.testing.assert_allclose(np.asarray(w), np.asarray(w_ref), rtol=2e-2, atol=2e-2)

    print("KERNEL_OK")
</pallas_src>

<mosaic_0001>
module attributes {stable_mosaic.version = 11 : i64} {
  func.func @segment_attention_kernel(%arg0: i32, %arg1: memref<1xi32, #tpu.memory_space<smem>>, %arg2: memref<8x16x32xbf16, #tpu.memory_space<vmem>>, %arg3: memref<16x1xi32, #tpu.memory_space<vmem>>, %arg4: memref<32x768xbf16, #tpu.memory_space<vmem>>, %arg5: memref<1x768xf32, #tpu.memory_space<vmem>>, %arg6: memref<128x384xbf16, #tpu.memory_space<vmem>>, %arg7: memref<128x384xbf16, #tpu.memory_space<vmem>>, %arg8: memref<1x384xf32, #tpu.memory_space<vmem>>, %arg9: memref<1x384xf32, #tpu.memory_space<vmem>>, %arg10: memref<256x128xbf16, #tpu.memory_space<vmem>>, %arg11: memref<1x128xf32, #tpu.memory_space<vmem>>, %arg12: memref<16x256xf32, #tpu.memory_space<vmem>>, %arg13: memref<1x8x16xf32, #tpu.memory_space<vmem>>, %arg14: memref<8x16x768xbf16, #tpu.memory_space<vmem>>, %arg15: memref<8x16x256xbf16, #tpu.memory_space<vmem>>) attributes {dimension_semantics = [#tpu.dimension_semantics<parallel>], iteration_bounds = array<i64: 1>, scalar_prefetch = 1 : i64, scratch_operands = 2 : i64, tpu.core_type = #tpu.core_type<tc>, window_params = [{transform_indices = @transform_0, window_bounds = array<i64: 8, 16, 32>}, {transform_indices = @transform_1, window_bounds = array<i64: 16, 1>}, {pipeline_mode = #tpu.pipeline_mode<synchronous>, transform_indices = @transform_2, window_bounds = array<i64: 32, 768>}, {pipeline_mode = #tpu.pipeline_mode<synchronous>, transform_indices = @transform_3, window_bounds = array<i64: 1, 768>}, {pipeline_mode = #tpu.pipeline_mode<synchronous>, transform_indices = @transform_4, window_bounds = array<i64: 128, 384>}, {pipeline_mode = #tpu.pipeline_mode<synchronous>, transform_indices = @transform_5, window_bounds = array<i64: 128, 384>}, {pipeline_mode = #tpu.pipeline_mode<synchronous>, transform_indices = @transform_6, window_bounds = array<i64: 1, 384>}, {pipeline_mode = #tpu.pipeline_mode<synchronous>, transform_indices = @transform_7, window_bounds = array<i64: 1, 384>}, {pipeline_mode = #tpu.pipeline_mode<synchronous>, transform_indices = @transform_8, window_bounds = array<i64: 256, 128>}, {pipeline_mode = #tpu.pipeline_mode<synchronous>, transform_indices = @transform_9, window_bounds = array<i64: 1, 128>}, {transform_indices = @transform_10, window_bounds = array<i64: 16, 256>}, {transform_indices = @transform_11, window_bounds = array<i64: 1, 8, 16>}]} {
    %c0 = arith.constant 0 : index
    %c0_0 = arith.constant 0 : index
    %0 = vector.load %arg3[%c0, %c0_0] : memref<16x1xi32, #tpu.memory_space<vmem>>, vector<16x1xi32>
    %1 = arith.index_cast %arg0 : i32 to index
    %2 = memref.load %arg1[%1] : memref<1xi32, #tpu.memory_space<smem>>
    %c0_1 = arith.constant 0 : index
    %c0_2 = arith.constant 0 : index
    %c0_3 = arith.constant 0 : index
    %3 = vector.load %arg2[%c0_1, %c0_2, %c0_3] : memref<8x16x32xbf16, #tpu.memory_space<vmem>>, vector<8x16x32xbf16>
    %4 = vector.shape_cast %3 : vector<8x16x32xbf16> to vector<128x32xbf16>
    %c0_4 = arith.constant 0 : index
    %c0_5 = arith.constant 0 : index
    %5 = vector.load %arg4[%c0_4, %c0_5] : memref<32x768xbf16, #tpu.memory_space<vmem>>, vector<32x768xbf16>
    %cst = arith.constant dense<0.000000e+00> : vector<128x768xf32>
    %6 = tpu.matmul %4, %5, %cst {dimension_numbers = #tpu.dot_dimension_numbers<[1], [0], [0], [1], [0, 0, 1, 1], [], []>} : vector<128x32xbf16>, vector<32x768xbf16>, vector<128x768xf32> -> vector<128x768xf32>
    %c0_6 = arith.constant 0 : index
    %c0_7 = arith.constant 0 : index
    %7 = vector.load %arg5[%c0_6, %c0_7] : memref<1x768xf32, #tpu.memory_space<vmem>>, vector<1x768xf32>
    %8 = vector.broadcast %7 : vector<1x768xf32> to vector<128x768xf32>
    %9 = arith.addf %6, %8 : vector<128x768xf32>
    %10 = vector.shape_cast %9 : vector<128x768xf32> to vector<8x16x768xf32>
    %11 = arith.truncf %10 : vector<8x16x768xf32> to vector<8x16x768xbf16>
    %c0_8 = arith.constant 0 : index
    %c0_9 = arith.constant 0 : index
    %c0_10 = arith.constant 0 : index
    %12 = vector.load %arg14[%c0_8, %c0_9, %c0_10] : memref<8x16x768xbf16, #tpu.memory_space<vmem>>, vector<8x16x768xbf16>
    tpu.vector_store %arg14[%c0_8, %c0_9, %c0_10], %11 {strides = array<i32>} : memref<8x16x768xbf16, #tpu.memory_space<vmem>>, vector<8x16x768xbf16>,
    %c0_11 = arith.constant 0 : index
    %c0_12 = arith.constant 0 : index
    %13 = vector.load %arg8[%c0_11, %c0_12] : memref<1x384xf32, #tpu.memory_space<vmem>>, vector<1x384xf32>
    %14 = vector.shape_cast %13 : vector<1x384xf32> to vector<1x384xf32>
    %15 = vector.broadcast %14 : vector<1x384xf32> to vector<16x384xf32>
    %c0_13 = arith.constant 0 : index
    %c0_14 = arith.constant 0 : index
    %16 = vector.load %arg9[%c0_13, %c0_14] : memref<1x384xf32, #tpu.memory_space<vmem>>, vector<1x384xf32>
    %17 = vector.shape_cast %16 : vector<1x384xf32> to vector<1x384xf32>
    %18 = vector.broadcast %17 : vector<1x384xf32> to vector<16x384xf32>
    %c0_15 = arith.constant 0 : index
    %c0_16 = arith.constant 0 : index
    %19 = vector.load %arg6[%c0_15, %c0_16] : memref<128x384xbf16, #tpu.memory_space<vmem>>, vector<128x384xbf16>
    %c0_17 = arith.constant 0 : index
    %c0_18 = arith.constant 0 : index
    %20 = vector.load %arg7[%c0_17, %c0_18] : memref<128x384xbf16, #tpu.memory_space<vmem>>, vector<128x384xbf16>
    %cst_19 = arith.constant 0.000000e+00 : f32
    %21 = vector.broadcast %cst_19 : f32 to vector<16x128xf32>
    %c0_i32 = arith.constant 0 : i32
    %22 = arith.subi %2, %c0_i32 : i32
    %23 = arith.addi %c0_i32, %22 : i32
    %c1_i32 = arith.constant 1 : i32
    %24:2 = scf.for %arg16 = %c0_i32 to %23 step %c1_i32 iter_args(%arg17 = %21, %arg18 = %21) -> (vector<16x128xf32>, vector<16x128xf32>)  : i32 {
      %c1_i32_41 = arith.constant 1 : i32
      %63 = arith.subi %2, %c1_i32_41 : i32
      %64 = arith.subi %63, %arg16 : i32
      %65 = arith.index_cast %arg16 : i32 to index
      %c0_42 = arith.constant 0 : index
      %c0_43 = arith.constant 0 : index
      %66 = vector.load %arg14[%65, %c0_42, %c0_43] : memref<8x16x768xbf16, #tpu.memory_space<vmem>>, vector<1x16x384xbf16>
      %67 = vector.shape_cast %66 : vector<1x16x384xbf16> to vector<16x384xbf16>
      %68 = arith.index_cast %64 : i32 to index
      %c0_44 = arith.constant 0 : index
      %c384 = arith.constant 384 : index
      %69 = vector.load %arg14[%68, %c0_44, %c384] : memref<8x16x768xbf16, #tpu.memory_space<vmem>>, vector<1x16x384xbf16>
      %70 = vector.shape_cast %69 : vector<1x16x384xbf16> to vector<16x384xbf16>
      %71 = arith.truncf %arg17 : vector<16x128xf32> to vector<16x128xbf16>
      %cst_45 = arith.constant dense<0.000000e+00> : vector<16x384xf32>
      %72 = tpu.matmul %71, %19, %cst_45 {dimension_numbers = #tpu.dot_dimension_numbers<[1], [0], [0], [1], [0, 0, 1, 1], [], []>} : vector<16x128xbf16>, vector<128x384xbf16>, vector<16x384xf32> -> vector<16x384xf32>
      %73 = arith.addf %72, %15 : vector<16x384xf32>
      %74 = arith.truncf %arg18 : vector<16x128xf32> to vector<16x128xbf16>
      %cst_46 = arith.constant dense<0.000000e+00> : vector<16x384xf32>
      %75 = tpu.matmul %74, %20, %cst_46 {dimension_numbers = #tpu.dot_dimension_numbers<[1], [0], [0], [1], [0, 0, 1, 1], [], []>} : vector<16x128xbf16>, vector<128x384xbf16>, vector<16x384xf32> -> vector<16x384xf32>
      %76 = arith.addf %75, %18 : vector<16x384xf32>
      %77 = vector.extract_strided_slice %67 {offsets = [0, 0], sizes = [16, 128], strides = [1, 1]} : vector<16x384xbf16> to vector<16x128xbf16>
      %78 = vector.extract_strided_slice %73 {offsets = [0, 0], sizes = [16, 128], strides = [1, 1]} : vector<16x384xf32> to vector<16x128xf32>
      %79 = arith.extf %77 : vector<16x128xbf16> to vector<16x128xf32>
      %80 = arith.addf %79, %78 : vector<16x128xf32>
      %81 = arith.negf %80 : vector<16x128xf32>
      %82 = math.exp %81 : vector<16x128xf32>
      %cst_47 = arith.constant 1.000000e+00 : f32
      %83 = vector.broadcast %cst_47 : f32 to vector<16x128xf32>
      %84 = arith.addf %83, %82 : vector<16x128xf32>
      %85 = arith.divf %83, %84 : vector<16x128xf32>
      %86 = vector.extract_strided_slice %67 {offsets = [0, 128], sizes = [16, 128], strides = [1, 1]} : vector<16x384xbf16> to vector<16x128xbf16>
      %87 = vector.extract_strided_slice %73 {offsets = [0, 128], sizes = [16, 128], strides = [1, 1]} : vector<16x384xf32> to vector<16x128xf32>
      %88 = arith.extf %86 : vector<16x128xbf16> to vector<16x128xf32>
      %89 = arith.addf %88, %87 : vector<16x128xf32>
      %90 = arith.negf %89 : vector<16x128xf32>
      %91 = math.exp %90 : vector<16x128xf32>
      %cst_48 = arith.constant 1.000000e+00 : f32
      %92 = vector.broadcast %cst_48 : f32 to vector<16x128xf32>
      %93 = arith.addf %92, %91 : vector<16x128xf32>
      %94 = arith.divf %92, %93 : vector<16x128xf32>
      %95 = vector.extract_strided_slice %67 {offsets = [0, 256], sizes = [16, 128], strides = [1, 1]} : vector<16x384xbf16> to vector<16x128xbf16>
      %96 = vector.extract_strided_slice %73 {offsets = [0, 256], sizes = [16, 128], strides = [1, 1]} : vector<16x384xf32> to vector<16x128xf32>
      %97 = arith.mulf %85, %96 : vector<16x128xf32>
      %98 = arith.extf %95 : vector<16x128xbf16> to vector<16x128xf32>
      %99 = arith.addf %98, %97 : vector<16x128xf32>
      %100 = math.tanh %99 : vector<16x128xf32>
      %101 = arith.subf %arg17, %100 : vector<16x128xf32>
      %102 = arith.mulf %94, %101 : vector<16x128xf32>
      %103 = arith.addf %100, %102 : vector<16x128xf32>
      %104 = vector.extract_strided_slice %70 {offsets = [0, 0], sizes = [16, 128], strides = [1, 1]} : vector<16x384xbf16> to vector<16x128xbf16>
      %105 = vector.extract_strided_slice %76 {offsets = [0, 0], sizes = [16, 128], strides = [1, 1]} : vector<16x384xf32> to vector<16x128xf32>
      %106 = arith.extf %104 : vector<16x128xbf16> to vector<16x128xf32>
      %107 = arith.addf %106, %105 : vector<16x128xf32>
      %108 = arith.negf %107 : vector<16x128xf32>
      %109 = math.exp %108 : vector<16x128xf32>
      %cst_49 = arith.constant 1.000000e+00 : f32
      %110 = vector.broadcast %cst_49 : f32 to vector<16x128xf32>
      %111 = arith.addf %110, %109 : vector<16x128xf32>
      %112 = arith.divf %110, %111 : vector<16x128xf32>
      %113 = vector.extract_strided_slice %70 {offsets = [0, 128], sizes = [16, 128], strides = [1, 1]} : vector<16x384xbf16> to vector<16x128xbf16>
      %114 = vector.extract_strided_slice %76 {offsets = [0, 128], sizes = [16, 128], strides = [1, 1]} : vector<16x384xf32> to vector<16x128xf32>
      %115 = arith.extf %113 : vector<16x128xbf16> to vector<16x128xf32>
      %116 = arith.addf %115, %114 : vector<16x128xf32>
      %117 = arith.negf %116 : vector<16x128xf32>
      %118 = math.exp %117 : vector<16x128xf32>
      %cst_50 = arith.constant 1.000000e+00 : f32
      %119 = vector.broadcast %cst_50 : f32 to vector<16x128xf32>
      %120 = arith.addf %119, %118 : vector<16x128xf32>
      %121 = arith.divf %119, %120 : vector<16x128xf32>
      %122 = vector.extract_strided_slice %70 {offsets = [0, 256], sizes = [16, 128], strides = [1, 1]} : vector<16x384xbf16> to vector<16x128xbf16>
      %123 = vector.extract_strided_slice %76 {offsets = [0, 256], sizes = [16, 128], strides = [1, 1]} : vector<16x384xf32> to vector<16x128xf32>
      %124 = arith.mulf %112, %123 : vector<16x128xf32>
      %125 = arith.extf %122 : vector<16x128xbf16> to vector<16x128xf32>
      %126 = arith.addf %125, %124 : vector<16x128xf32>
      %127 = math.tanh %126 : vector<16x128xf32>
      %128 = arith.subf %arg18, %127 : vector<16x128xf32>
      %129 = arith.mulf %121, %128 : vector<16x128xf32>
      %130 = arith.addf %127, %129 : vector<16x128xf32>
      %131 = vector.broadcast %arg16 : i32 to vector<16x1xi32>
      %132 = arith.cmpi slt, %131, %0 : vector<16x1xi32>
      %133 = vector.broadcast %64 : i32 to vector<16x1xi32>
      %134 = arith.cmpi slt, %133, %0 : vector<16x1xi32>
      %cst_51 = arith.constant 0.000000e+00 : f32
      %135 = vector.shape_cast %132 : vector<16x1xi1> to vector<16x1xi1>
      %136 = vector.broadcast %135 : vector<16x1xi1> to vector<16x128xi1>
      %137 = vector.broadcast %cst_51 : f32 to vector<16x128xf32>
      %138 = arith.select %136, %103, %137 : vector<16x128xi1>, vector<16x128xf32>
      %139 = arith.truncf %138 : vector<16x128xf32> to vector<16x128xbf16>
      %140 = arith.index_cast %arg16 : i32 to index
      %c0_52 = arith.constant 0 : index
      %c0_53 = arith.constant 0 : index
      %141 = vector.load %arg15[%140, %c0_52, %c0_53] : memref<8x16x256xbf16, #tpu.memory_space<vmem>>, vector<1x16x128xbf16>
      %142 = vector.shape_cast %141 : vector<1x16x128xbf16> to vector<16x128xbf16>
      %143 = vector.shape_cast %139 : vector<16x128xbf16> to vector<1x16x128xbf16>
      tpu.vector_store %arg15[%140, %c0_52, %c0_53], %143 {strides = array<i32>} : memref<8x16x256xbf16, #tpu.memory_space<vmem>>, vector<1x16x128xbf16>,
      %cst_54 = arith.constant 0.000000e+00 : f32
      %144 = vector.shape_cast %134 : vector<16x1xi1> to vector<16x1xi1>
      %145 = vector.broadcast %144 : vector<16x1xi1> to vector<16x128xi1>
      %146 = vector.broadcast %cst_54 : f32 to vector<16x128xf32>
      %147 = arith.select %145, %130, %146 : vector<16x128xi1>, vector<16x128xf32>
      %148 = arith.truncf %147 : vector<16x128xf32> to vector<16x128xbf16>
      %149 = arith.index_cast %64 : i32 to index
      %c0_55 = arith.constant 0 : index
      %c128 = arith.constant 128 : index
      %150 = vector.load %arg15[%149, %c0_55, %c128] : memref<8x16x256xbf16, #tpu.memory_space<vmem>>, vector<1x16x128xbf16>
      %151 = vector.shape_cast %150 : vector<1x16x128xbf16> to vector<16x128xbf16>
      %152 = vector.shape_cast %148 : vector<16x128xbf16> to vector<1x16x128xbf16>
      tpu.vector_store %arg15[%149, %c0_55, %c128], %152 {strides = array<i32>} : memref<8x16x256xbf16, #tpu.memory_space<vmem>>, vector<1x16x128xbf16>,
      %153 = vector.shape_cast %132 : vector<16x1xi1> to vector<16x1xi1>
      %154 = vector.broadcast %153 : vector<16x1xi1> to vector<16x128xi1>
      %155 = arith.select %154, %103, %arg17 : vector<16x128xi1>, vector<16x128xf32>
      %156 = vector.shape_cast %134 : vector<16x1xi1> to vector<16x1xi1>
      %157 = vector.broadcast %156 : vector<16x1xi1> to vector<16x128xi1>
      %158 = arith.select %157, %130, %arg18 : vector<16x128xi1>, vector<16x128xf32>
      scf.yield %155, %158 : vector<16x128xf32>, vector<16x128xf32>
    }
    %cst_20 = arith.constant 0.000000e+00 : bf16
    %25 = vector.broadcast %cst_20 : bf16 to vector<16x256xbf16>
    %c0_i32_21 = arith.constant 0 : i32
    %c8_i32 = arith.constant 8 : i32
    %26 = arith.subi %c8_i32, %2 : i32
    %27 = arith.addi %2, %26 : i32
    %c1_i32_22 = arith.constant 1 : i32
    scf.for %arg16 = %2 to %27 step %c1_i32_22  : i32 {
      %63 = arith.index_cast %arg16 : i32 to index
      %c0_41 = arith.constant 0 : index
      %c0_42 = arith.constant 0 : index
      %64 = vector.load %arg15[%63, %c0_41, %c0_42] : memref<8x16x256xbf16, #tpu.memory_space<vmem>>, vector<1x16x256xbf16>
      %65 = vector.shape_cast %64 : vector<1x16x256xbf16> to vector<16x256xbf16>
      %66 = vector.shape_cast %25 : vector<16x256xbf16> to vector<1x16x256xbf16>
      tpu.vector_store %arg15[%63, %c0_41, %c0_42], %66 {strides = array<i32>} : memref<8x16x256xbf16, #tpu.memory_space<vmem>>, vector<1x16x256xbf16>,
    }
    %c0_23 = arith.constant 0 : index
    %c0_24 = arith.constant 0 : index
    %c0_25 = arith.constant 0 : index
    %28 = vector.load %arg15[%c0_23, %c0_24, %c0_25] : memref<8x16x256xbf16, #tpu.memory_space<vmem>>, vector<8x16x256xbf16>
    %29 = vector.shape_cast %28 : vector<8x16x256xbf16> to vector<128x256xbf16>
    %c0_26 = arith.constant 0 : index
    %c0_27 = arith.constant 0 : index
    %30 = vector.load %arg10[%c0_26, %c0_27] : memref<256x128xbf16, #tpu.memory_space<vmem>>, vector<256x128xbf16>
    %cst_28 = arith.constant dense<0.000000e+00> : vector<128x128xf32>
    %31 = tpu.matmul %29, %30, %cst_28 {dimension_numbers = #tpu.dot_dimension_numbers<[1], [0], [0], [1], [0, 0, 1, 1], [], []>} : vector<128x256xbf16>, vector<256x128xbf16>, vector<128x128xf32> -> vector<128x128xf32>
    %32 = math.tanh %31 : vector<128x128xf32>
    %33 = vector.shape_cast %32 : vector<128x128xf32> to vector<8x16x128xf32>
    %c0_29 = arith.constant 0 : index
    %c0_30 = arith.constant 0 : index
    %34 = vector.load %arg11[%c0_29, %c0_30] : memref<1x128xf32, #tpu.memory_space<vmem>>, vector<1x128xf32>
    %35 = vector.shape_cast %34 : vector<1x128xf32> to vector<1x1x128xf32>
    %36 = vector.broadcast %35 : vector<1x1x128xf32> to vector<8x16x128xf32>
    %37 = arith.mulf %33, %36 : vector<8x16x128xf32>
    %cst_31 = arith.constant dense<0.000000e+00> : vector<8x16xf32>
    %38 = vector.multi_reduction <add>, %37, %cst_31 [2] : vector<8x16x128xf32> to vector<8x16xf32>
    %39 = tpu.iota {dimensions = array<i32: 0>} : vector<8x16xi32>
    %40 = tpu.transpose %0, [1, 0] : vector<16x1xi32> -> vector<1x16xi32>
    %41 = vector.broadcast %40 : vector<1x16xi32> to vector<8x16xi32>
    %42 = arith.cmpi slt, %39, %41 : vector<8x16xi32>
    %cst_32 = arith.constant -1.000000e+30 : f32
    %43 = vector.broadcast %cst_32 : f32 to vector<8x16xf32>
    %44 = arith.select %42, %38, %43 : vector<8x16xi1>, vector<8x16xf32>
    %cst_33 = arith.constant dense<0xFF800000> : vector<16xf32>
    %45 = vector.multi_reduction <maximumf>, %44, %cst_33 [0] : vector<8x16xf32> to vector<16xf32>
    %46 = vector.shape_cast %45 : vector<16xf32> to vector<1x16xf32>
    %47 = vector.broadcast %46 : vector<1x16xf32> to vector<8x16xf32>
    %48 = arith.subf %44, %47 : vector<8x16xf32>
    %49 = math.exp %48 : vector<8x16xf32>
    %cst_34 = arith.constant dense<0.000000e+00> : vector<16xf32>
    %50 = vector.multi_reduction <add>, %49, %cst_34 [0] : vector<8x16xf32> to vector<16xf32>
    %51 = vector.shape_cast %50 : vector<16xf32> to vector<1x16xf32>
    %52 = tpu.reciprocal %51 {approx = true} : vector<1x16xf32> -> vector<1x16xf32>
    %53 = vector.broadcast %52 : vector<1x16xf32> to vector<8x16xf32>
    %54 = arith.mulf %49, %53 : vector<8x16xf32>
    %55 = vector.shape_cast %54 : vector<8x16xf32> to vector<8x16x1xf32>
    %56 = arith.extf %28 : vector<8x16x256xbf16> to vector<8x16x256xf32>
    %57 = vector.broadcast %55 : vector<8x16x1xf32> to vector<8x16x256xf32>
    %58 = arith.mulf %57, %56 : vector<8x16x256xf32>
    %cst_35 = arith.constant dense<0.000000e+00> : vector<16x256xf32>
    %59 = vector.multi_reduction <add>, %58, %cst_35 [0] : vector<8x16x256xf32> to vector<16x256xf32>
    %c0_36 = arith.constant 0 : index
    %c0_37 = arith.constant 0 : index
    %60 = vector.load %arg12[%c0_36, %c0_37] : memref<16x256xf32, #tpu.memory_space<vmem>>, vector<16x256xf32>
    tpu.vector_store %arg12[%c0_36, %c0_37], %59 {strides = array<i32>} : memref<16x256xf32, #tpu.memory_space<vmem>>, vector<16x256xf32>,
    %61 = vector.shape_cast %54 : vector<8x16xf32> to vector<1x8x16xf32>
    %c0_38 = arith.constant 0 : index
    %c0_39 = arith.constant 0 : index
    %c0_40 = arith.constant 0 : index
    %62 = vector.load %arg13[%c0_38, %c0_39, %c0_40] : memref<1x8x16xf32, #tpu.memory_space<vmem>>, vector<1x8x16xf32>
    tpu.vector_store %arg13[%c0_38, %c0_39, %c0_40], %61 {strides = array<i32>} : memref<1x8x16xf32, #tpu.memory_space<vmem>>, vector<1x8x16xf32>,
    return
  }
  func.func @transform_0(%arg0: i32, %arg1: memref<1xi32, #tpu.memory_space<smem>>) -> (i32, i32, i32) {
    %c0_i32 = arith.constant 0 : i32
    %c0_i32_0 = arith.constant 0 : i32
    %c0_i32_1 = arith.constant 0 : i32
    return %c0_i32, %arg0, %c0_i32_0 : i32, i32, i32
  }
  func.func @transform_1(%arg0: i32, %arg1: memref<1xi32, #tpu.memory_space<smem>>) -> (i32, i32) {
    %c0_i32 = arith.constant 0 : i32
    %c0_i32_0 = arith.constant 0 : i32
    return %arg0, %c0_i32 : i32, i32
  }
  func.func @transform_2(%arg0: i32, %arg1: memref<1xi32, #tpu.memory_space<smem>>) -> (i32, i32) {
    %c0_i32 = arith.constant 0 : i32
    %c0_i32_0 = arith.constant 0 : i32
    %c0_i32_1 = arith.constant 0 : i32
    return %c0_i32, %c0_i32_0 : i32, i32
  }
  func.func @transform_3(%arg0: i32, %arg1: memref<1xi32, #tpu.memory_space<smem>>) -> (i32, i32) {
    %c0_i32 = arith.constant 0 : i32
    %c0_i32_0 = arith.constant 0 : i32
    %c0_i32_1 = arith.constant 0 : i32
    return %c0_i32, %c0_i32_0 : i32, i32
  }
  func.func @transform_4(%arg0: i32, %arg1: memref<1xi32, #tpu.memory_space<smem>>) -> (i32, i32) {
    %c0_i32 = arith.constant 0 : i32
    %c0_i32_0 = arith.constant 0 : i32
    %c0_i32_1 = arith.constant 0 : i32
    return %c0_i32, %c0_i32_0 : i32, i32
  }
  func.func @transform_5(%arg0: i32, %arg1: memref<1xi32, #tpu.memory_space<smem>>) -> (i32, i32) {
    %c0_i32 = arith.constant 0 : i32
    %c0_i32_0 = arith.constant 0 : i32
    %c0_i32_1 = arith.constant 0 : i32
    return %c0_i32, %c0_i32_0 : i32, i32
  }
  func.func @transform_6(%arg0: i32, %arg1: memref<1xi32, #tpu.memory_space<smem>>) -> (i32, i32) {
    %c0_i32 = arith.constant 0 : i32
    %c0_i32_0 = arith.constant 0 : i32
    %c0_i32_1 = arith.constant 0 : i32
    return %c0_i32, %c0_i32_0 : i32, i32
  }
  func.func @transform_7(%arg0: i32, %arg1: memref<1xi32, #tpu.memory_space<smem>>) -> (i32, i32) {
    %c0_i32 = arith.constant 0 : i32
    %c0_i32_0 = arith.constant 0 : i32
    %c0_i32_1 = arith.constant 0 : i32
    return %c0_i32, %c0_i32_0 : i32, i32
  }
  func.func @transform_8(%arg0: i32, %arg1: memref<1xi32, #tpu.memory_space<smem>>) -> (i32, i32) {
    %c0_i32 = arith.constant 0 : i32
    %c0_i32_0 = arith.constant 0 : i32
    %c0_i32_1 = arith.constant 0 : i32
    return %c0_i32, %c0_i32_0 : i32, i32
  }
  func.func @transform_9(%arg0: i32, %arg1: memref<1xi32, #tpu.memory_space<smem>>) -> (i32, i32) {
    %c0_i32 = arith.constant 0 : i32
    %c0_i32_0 = arith.constant 0 : i32
    %c0_i32_1 = arith.constant 0 : i32
    return %c0_i32, %c0_i32_0 : i32, i32
  }
  func.func @transform_10(%arg0: i32, %arg1: memref<1xi32, #tpu.memory_space<smem>>) -> (i32, i32) {
    %c0_i32 = arith.constant 0 : i32
    %c0_i32_0 = arith.constant 0 : i32
    return %arg0, %c0_i32 : i32, i32
  }
  func.func @transform_11(%arg0: i32, %arg1: memref<1xi32, #tpu.memory_space<smem>>) -> (i32, i32, i32) {
    %c0_i32 = arith.constant 0 : i32
    %c0_i32_0 = arith.constant 0 : i32
    %c0_i32_1 = arith.constant 0 : i32
    return %arg0, %c0_i32, %c0_i32_0 : i32, i32, i32
  }
}

</mosaic_0001>

<bundles_post_ra>
// kernel: tpu_custom_call.1
= control target key start
LH: loop header
LB: loop body
LE: loop exit
PB: predicated region body
PF: predicated region fallthrough
CT: control target
= control target key end

     0   :  { %19 = vsyncpa [#allocation7], 0  ;;  %s4136_s0 = inlined_call_operand.<no memory space> [shape: s32[1], index: 0, kind: input, shape index: {}]   ;;  %s4137_s1 = inlined_call_operand.hbm [shape: bf16[8,16,32], index: 1, kind: input, shape index: {}]   ;;  %s4138_s2 = inlined_call_operand.vmem [shape: s32[16,1], index: 2, kind: input, shape index: {}]   ;;  %s4139_s3 = inlined_call_operand.hbm [shape: bf16[32,768], index: 3, kind: input, shape index: {}]   ;;  %s4140_s4 = inlined_call_operand.vmem [shape: f32[1,768], index: 4, kind: input, shape index: {}]   ;;  %s4141_s5 = inlined_call_operand.hbm [shape: bf16[128,384], index: 5, kind: input, shape index: {}]   ;;  %s4142_s6 = inlined_call_operand.hbm [shape: bf16[128,384], index: 6, kind: input, shape index: {}]   ;;  %s4143_s7 = inlined_call_operand.vmem [shape: f32[1,384], index: 7, kind: input, shape index: {}]   ;;  %s4144_s8 = inlined_call_operand.vmem [shape: f32[1,384], index: 8, kind: input, shape index: {}]   ;;  %s4145_s9 = inlined_call_operand.hbm [shape: bf16[256,128], index: 9, kind: input, shape index: {}]   ;;  %s4146_s10 = inlined_call_operand.vmem [shape: f32[1,128], index: 10, kind: input, shape index: {}]   ;;  %s4147_s11 = inlined_call_operand.hbm [shape: f32[16,256], index: 11, kind: output, shape index: {0}]   ;;  %s4148_s12 = inlined_call_operand.hbm [shape: f32[1,8,16], index: 12, kind: output, shape index: {1}]  }
   0x1   :  { %20 = vsyncpa [#allocation10], 0 }
   0x2   :  { %21 = vsyncpa [#allocation13], 0 }
   0x3   :  { %22 = vsyncpa [#allocation8], 0 }
   0x4   :  { %23 = vsyncpa [#allocation17], 0  ;;  %s3303_s21 = smov [#allocation9]  }
   0x5   :  { %s43_s22 = sshll.u32 %s3303_s21, 4  ;;  %s44_s22 = int_to_ptr.vmem [resolvable:$true] %s43_s22 }
   0x6   :  { %s3113_s23 = scalar_lea.vmem %s44_s22, 1536  ;;  %p3118_p1 = scmp.lt.s32.totalorder %s44_s22, %s44_s22 }
   0x7   :  { %p3114_p0 = scmp.ne.s32.totalorder %s44_s22, %s3113_s23  ;;  %p3119_p2 = scmp.lt.s32.totalorder %s3113_s23, %s3113_s23 }
   0x9   :  { %p3120_p3 = por %p3119_p2, %p3118_p1 }
   0xb   :  { %p3121_p4 = pnand %p3120_p3, %p3114_p0 }
   0xd   :  { %3124 = shalt.err (!%p3121_p4)
}
   0xe   :  { %s3304_s24 = smov 384   ;;  %s3305_s25 = smov 24  }
   0xf   :  { %49 = dma.hbm_to_vmem [thread:$0]  %s4139_s3, 1536, %s44_s22, [#allocation10], %s3304_s24, %s3304_s24, %s3305_s25  }
  0x10   :  { %s3306_s28 = smov [#allocation12]   ;;  %s3307_s30 = smov [#allocation6]  }
  0x11   :  { %s69_s29 = sshll.u32 %s3306_s28, 4  ;;  %s29_s13 = sshll.u32 %s3307_s30, 4  ;;  %s70_s29 = int_to_ptr.vmem [resolvable:$true] %s69_s29  ;;  %s30_s13 = int_to_ptr.vmem [resolvable:$true] %s29_s13 }
  0x12   :  { %s3133_s14 = scalar_lea.vmem %s70_s29, 3072  ;;  %p3138_p6 = scmp.lt.s32.totalorder %s70_s29, %s70_s29 }
  0x13   :  { %p3134_p5 = scmp.ne.s32.totalorder %s70_s29, %s3133_s14  ;;  %p3139_p7 = scmp.lt.s32.totalorder %s3133_s14, %s3133_s14 }
  0x15   :  { %p3140_p8 = por %p3139_p7, %p3138_p6 }
  0x17   :  { %p3141_p9 = pnand %p3140_p8, %p3134_p5 }
  0x19   :  { %3144 = shalt.err (!%p3141_p9)
}
  0x1a   :  { %s3308_s15 = smov 192   ;;  %s3309_s16 = smov 12  }
  0x1b   :  { %75 = dma.hbm_to_vmem [thread:$0]  %s4142_s6, 3072, %s70_s29, [#allocation13], %s3308_s15, %s3308_s15, %s3309_s16  }
  0x1c   :  { %s3153_s3 = scalar_lea.vmem %s30_s13, 1024  ;;  %p3158_p11 = scmp.lt.s32.totalorder %s30_s13, %s30_s13 }
  0x1d   :  { %p3154_p10 = scmp.ne.s32.totalorder %s30_s13, %s3153_s3  ;;  %p3159_p12 = scmp.lt.s32.totalorder %s3153_s3, %s3153_s3 }
  0x1f   :  { %p3160_p13 = por %p3159_p12, %p3158_p11 }
  0x21   :  { %p3161_p0 = pnand %p3160_p13, %p3154_p10 }
  0x23   :  { %3164 = shalt.err (!%p3161_p0)
}
  0x24   :  { %s3310_s19 = smov 64   ;;  %s3311_s20 = smov 4  }
  0x25   :  { %35 = dma.hbm_to_vmem [thread:$0]  %s4137_s1, 1024, %s30_s13, [#allocation7], %s3310_s19, %s3310_s19, %s3311_s20  }
  0x26   :  { %s3312_s23 = smov [#allocation11]   ;;  %s3313_s25 = smov [#allocation14]  }
  0x27   :  { %s57_s24 = sshll.u32 %s3312_s23, 4  ;;  %s85_s26 = sshll.u32 %s3313_s25, 4  ;;  %s58_s24 = int_to_ptr.vmem [resolvable:$true] %s57_s24  ;;  %s86_s26 = int_to_ptr.vmem [resolvable:$true] %s85_s26 }
  0x28   :  { %s3173_s6 = scalar_lea.vmem %s58_s24, 3072  ;;  %p3178_p2 = scmp.lt.s32.totalorder %s58_s24, %s58_s24 }
  0x29   :  { %p3174_p1 = scmp.ne.s32.totalorder %s58_s24, %s3173_s6  ;;  %p3179_p3 = scmp.lt.s32.totalorder %s3173_s6, %s3173_s6 }
  0x2b   :  { %p3180_p4 = por %p3179_p3, %p3178_p2 }
  0x2d   :  { %p3181_p5 = pnand %p3180_p4, %p3174_p1 }
  0x2f   :  { %3184 = shalt.err (!%p3181_p5)
}
  0x30   :  { %63 = dma.hbm_to_vmem [thread:$0]  %s4141_s5, 3072, %s58_s24, [#allocation10], %s3308_s15, %s3308_s15, %s3309_s16  }
  0x31   :  { %s3193_s29 = scalar_lea.vmem %s86_s26, 2048  ;;  %p3198_p7 = scmp.lt.s32.totalorder %s86_s26, %s86_s26 }
  0x32   :  { %p3194_p6 = scmp.ne.s32.totalorder %s86_s26, %s3193_s29  ;;  %p3199_p8 = scmp.lt.s32.totalorder %s3193_s29, %s3193_s29 }
  0x34   :  { %p3200_p9 = por %p3199_p8, %p3198_p7 }
  0x36   :  { %p3201_p10 = pnand %p3200_p9, %p3194_p6 }
  0x38   :  { %3204 = shalt.err (!%p3201_p10)
}
  0x39   :  { %91 = dma.hbm_to_vmem [thread:$0]  %s4145_s9, 2048, %s86_s26, [#allocation13], %s3310_s19, %s3310_s19, %s3311_s20  }
  0x3a   :  { %3269 = dma.done.wait [#allocation7], 1024  }
  0x3b   :  { %3270 = vsyncadd [#allocation7], 4294966272 }
  0x3c   :  { %3271 = dma.done.wait [#allocation10], 4608  }
  0x3d   :  { %3272 = vsyncadd [#allocation10], 4294962688 }
  0x3e   :  { %3273 = dma.done.wait [#allocation13], 5120  }
  0x3f   :  { %3274 = vsyncadd [#allocation13], 4294962176  ;;  %v4149_v0 = vmov 0   ;;  %v3408_v1 = vld [vmem:[%s4138_s2] sm:$0xff]  ;;  %v3413_v2 = vld [vmem:[%s4138_s2 + $0x8] sm:$0xff]  ;;  %vm273_vm0 = vcmask 261120  }
  0x40   :  { %330 = vmatprep.mubr.bf16.mxu0 %v4149_v0  ;;  %370 = vmatprep.mubr.bf16.mxu1 %v4149_v0  ;;  %v3415_v3 = vld [vmem:[#allocation11] sm:$0xff]  ;;  %v3417_v4 = vld [vmem:[#allocation11 + $0x8] sm:$0xf]  ;;  %v3419_v5 = vld [vmem:[#allocation11 + $0xc] sm:$0xff]  ;;  %p2599_p11 = scmp.le.s32.totalorder %s4136_s0, 0 }
  0x41   :  { %4190 = vst [vmem:[#allocation23_spill] sm:$0xff] %v3415_v3  ;;  %4191 = vst [vmem:[#allocation24_spill] sm:$0xff] %v3417_v4  ;;  %v3421_v6 = vld [vmem:[#allocation11 + $0x14] sm:$0xf]  ;;  %v3423_v7 = vld [vmem:[#allocation11 + $0x18] sm:$0xff]  ;;  %s3767_s3 = smov (!%p2599_p11), 0  }
  0x42   :  { %4192 = vst [vmem:[#allocation25_spill] sm:$0xff] %v3419_v5  ;;  %4193 = vst [vmem:[#allocation26_spill] sm:$0xff] %v3421_v6  ;;  %v3425_v8 = vld [vmem:[#allocation11 + $0x20] sm:$0xf]  ;;  %v3427_v9 = vld [vmem:[#allocation11 + $0x24] sm:$0xff] }
  0x43   :  { %4194 = vst [vmem:[#allocation27_spill] sm:$0xff] %v3423_v7  ;;  %4195 = vst [vmem:[#allocation28_spill] sm:$0xff] %v3425_v8  ;;  %v3429_v10 = vld [vmem:[#allocation11 + $0x2c] sm:$0xf]  ;;  %v3431_v11 = vld [vmem:[#allocation11 + $0x30] sm:$0xff] }
  0x44   :  { %4196 = vst [vmem:[#allocation29_spill] sm:$0xff] %v3427_v9  ;;  %4197 = vst [vmem:[#allocation30_spill] sm:$0xff] %v3429_v10  ;;  %v3433_v12 = vld [vmem:[#allocation11 + $0x38] sm:$0xf]  ;;  %v3435_v13 = vld [vmem:[#allocation11 + $0x3c] sm:$0xff] }
  0x45   :  { %4198 = vst [vmem:[#allocation31_spill] sm:$0xff] %v3431_v11  ;;  %4199 = vst [vmem:[#allocation32_spill] sm:$0xff] %v3433_v12  ;;  %v3437_v14 = vld [vmem:[#allocation11 + $0x44] sm:$0xf]  ;;  %v3439_v15 = vld [vmem:[#allocation11 + $0x48] sm:$0xff] }
  0x46   :  { %4200 = vst [vmem:[#allocation33_spill] sm:$0xff] %v3435_v13  ;;  %4201 = vst [vmem:[#allocation34_spill] sm:$0xff] %v3437_v14  ;;  %v3441_v16 = vld [vmem:[#allocation11 + $0x50] sm:$0xf]  ;;  %v3443_v17 = vld [vmem:[#allocation11 + $0x54] sm:$0xff] }
  0x47   :  { %4202 = vst [vmem:[#allocation35_spill] sm:$0xff] %v3439_v15  ;;  %4203 = vst [vmem:[#allocation36_spill] sm:$0xff] %v3441_v16  ;;  %v3445_v18 = vld [vmem:[#allocation11 + $0x5c] sm:$0xf]  ;;  %v3447_v19 = vld [vmem:[#allocation11 + $0x60] sm:$0xff] }
  0x48   :  { %4204 = vst [vmem:[#allocation37_spill] sm:$0xff] %v3443_v17  ;;  %4205 = vst [vmem:[#allocation38_spill] sm:$0xff] %v3445_v18  ;;  %v3449_v20 = vld [vmem:[#allocation11 + $0x68] sm:$0xf]  ;;  %v3451_v21 = vld [vmem:[#allocation11 + $0x6c] sm:$0xff] }
  0x49   :  { %4206 = vst [vmem:[#allocation39_spill] sm:$0xff] %v3447_v19  ;;  %4207 = vst [vmem:[#allocation40_spill] sm:$0xff] %v3449_v20  ;;  %v3453_v22 = vld [vmem:[#allocation11 + $0x74] sm:$0xf]  ;;  %v3455_v23 = vld [vmem:[#allocation11 + $0x78] sm:$0xff] }
  0x4a   :  { %4208 = vst [vmem:[#allocation41_spill] sm:$0xff] %v3451_v21  ;;  %4209 = vst [vmem:[#allocation42_spill] sm:$0xff] %v3453_v22  ;;  %v3457_v24 = vld [vmem:[#allocation11 + $0x80] sm:$0xf]  ;;  %v3459_v25 = vld [vmem:[#allocation11 + $0x84] sm:$0xff] }
  0x4b   :  { %4210 = vst [vmem:[#allocation43_spill] sm:$0xff] %v3455_v23  ;;  %4211 = vst [vmem:[#allocation44_spill] sm:$0xff] %v3457_v24  ;;  %v3461_v26 = vld [vmem:[#allocation11 + $0x8c] sm:$0xf]  ;;  %v3463_v27 = vld [vmem:[#allocation11 + $0x90] sm:$0xff] }
  0x4c   :  { %4212 = vst [vmem:[#allocation45_spill] sm:$0xff] %v3459_v25  ;;  %v3465_v28 = vld [vmem:[#allocation11 + $0x98] sm:$0xf]  ;;  %v3467_v29 = vld [vmem:[#allocation11 + $0x9c] sm:$0xff]  ;;  %v3469_v30 = vld [vmem:[#allocation11 + $0xa4] sm:$0xf] }
  0x4d   :  { %v3471_v31 = vld [vmem:[#allocation11 + $0xa8] sm:$0xff]  ;;  %v3473_v32 = vld [vmem:[#allocation11 + $0xb0] sm:$0xf]  ;;  %v3475_v33 = vld [vmem:[#allocation11 + $0xb4] sm:$0xff] }
  0x4e   :  { %v3477_v34 = vld [vmem:[#allocation11 + $0xbc] sm:$0xf]  ;;  %v3479_v35 = vld [vmem:[#allocation12] sm:$0xff]  ;;  %v3481_v36 = vld [vmem:[#allocation12 + $0x8] sm:$0xf] }
  0x4f   :  { %4213 = vst [vmem:[#allocation46_spill] sm:$0xff] %v3479_v35  ;;  %4214 = vst [vmem:[#allocation47_spill] sm:$0xff] %v3481_v36  ;;  %v3483_v37 = vld [vmem:[#allocation12 + $0xc] sm:$0xff]  ;;  %v3485_v38 = vld [vmem:[#allocation12 + $0x14] sm:$0xf] }
  0x50   :  { %4215 = vst [vmem:[#allocation48_spill] sm:$0xff] %v3483_v37  ;;  %4216 = vst [vmem:[#allocation49_spill] sm:$0xff] %v3485_v38  ;;  %v3487_v39 = vld [vmem:[#allocation12 + $0x18] sm:$0xff]  ;;  %v3489_v40 = vld [vmem:[#allocation12 + $0x20] sm:$0xf] }
  0x51   :  { %4217 = vst [vmem:[#allocation50_spill] sm:$0xff] %v3487_v39  ;;  %4218 = vst [vmem:[#allocation51_spill] sm:$0xff] %v3489_v40  ;;  %v3491_v41 = vld [vmem:[#allocation12 + $0x24] sm:$0xff]  ;;  %v3493_v42 = vld [vmem:[#allocation12 + $0x2c] sm:$0xf] }
  0x52   :  { %4219 = vst [vmem:[#allocation52_spill] sm:$0xff] %v3491_v41  ;;  %4220 = vst [vmem:[#allocation53_spill] sm:$0xff] %v3493_v42  ;;  %v3495_v43 = vld [vmem:[#allocation12 + $0x30] sm:$0xff]  ;;  %v3497_v44 = vld [vmem:[#allocation12 + $0x38] sm:$0xf] }
  0x53   :  { %4221 = vst [vmem:[#allocation54_spill] sm:$0xff] %v3495_v43  ;;  %4222 = vst [vmem:[#allocation55_spill] sm:$0xff] %v3497_v44  ;;  %v3499_v45 = vld [vmem:[#allocation12 + $0x3c] sm:$0xff]  ;;  %v3501_v46 = vld [vmem:[#allocation12 + $0x44] sm:$0xf] }
  0x54   :  { %4223 = vst [vmem:[#allocation56_spill] sm:$0xff] %v3499_v45  ;;  %4224 = vst [vmem:[#allocation57_spill] sm:$0xff] %v3501_v46  ;;  %v3503_v47 = vld [vmem:[#allocation12 + $0x48] sm:$0xff]  ;;  %v3505_v48 = vld [vmem:[#allocation12 + $0x50] sm:$0xf] }
  0x55   :  { %4225 = vst [vmem:[#allocation58_spill] sm:$0xff] %v3503_v47  ;;  %4226 = vst [vmem:[#allocation59_spill] sm:$0xff] %v3505_v48  ;;  %v3507_v49 = vld [vmem:[#allocation12 + $0x54] sm:$0xff]  ;;  %v3509_v50 = vld [vmem:[#allocation12 + $0x5c] sm:$0xf] }
  0x56   :  { %4227 = vst [vmem:[#allocation60_spill] sm:$0xff] %v3507_v49  ;;  %4228 = vst [vmem:[#allocation61_spill] sm:$0xff] %v3509_v50  ;;  %v3511_v51 = vld [vmem:[#allocation12 + $0x60] sm:$0xff]  ;;  %v3513_v52 = vld [vmem:[#allocation12 + $0x68] sm:$0xf] }
  0x57   :  { %4229 = vst [vmem:[#allocation62_spill] sm:$0xff] %v3511_v51  ;;  %4230 = vst [vmem:[#allocation63_spill] sm:$0xff] %v3513_v52  ;;  %v3515_v53 = vld [vmem:[#allocation12 + $0x6c] sm:$0xff]  ;;  %v3517_v54 = vld [vmem:[#allocation12 + $0x74] sm:$0xf] }
  0x58   :  { %4231 = vst [vmem:[#allocation64_spill] sm:$0xff] %v3515_v53  ;;  %4232 = vst [vmem:[#allocation65_spill] sm:$0xff] %v3517_v54  ;;  %v3519_v55 = vld [vmem:[#allocation12 + $0x78] sm:$0xff]  ;;  %v3521_v56 = vld [vmem:[#allocation12 + $0x80] sm:$0xf] }
  0x59   :  { %4233 = vst [vmem:[#allocation66_spill] sm:$0xff] %v3519_v55  ;;  %4234 = vst [vmem:[#allocation67_spill] sm:$0xff] %v3521_v56  ;;  %v3523_v57 = vld [vmem:[#allocation12 + $0x84] sm:$0xff]  ;;  %v3525_v58 = vld [vmem:[#allocation12 + $0x8c] sm:$0xf] }
  0x5a   :  { %4235 = vst [vmem:[#allocation68_spill] sm:$0xff] %v3523_v57  ;;  %4236 = vst [vmem:[#allocation69_spill] sm:$0xff] %v3525_v58  ;;  %v3527_v59 = vld [vmem:[#allocation12 + $0x90] sm:$0xff]  ;;  %v3529_v60 = vld [vmem:[#allocation12 + $0x98] sm:$0xf] }
  0x5b   :  { %4237 = vst [vmem:[#allocation70_spill] sm:$0xff] %v3529_v60  ;;  %v3531_v61 = vld [vmem:[#allocation12 + $0x9c] sm:$0xff]  ;;  %v3533_v62 = vld [vmem:[#allocation12 + $0xa4] sm:$0xf]  ;;  %v3535_v63 = vld [vmem:[#allocation12 + $0xa8] sm:$0xff] }
  0x5c   :  { %4238 = vst [vmem:[#allocation71_spill] sm:$0xff] %v3533_v62  ;;  %v3537_v0 = vld [vmem:[#allocation12 + $0xb0] sm:$0xf]  ;;  %v3539_v36 = vld [vmem:[#allocation12 + $0xb4] sm:$0xff]  ;;  %v3541_v38 = vld [vmem:[#allocation12 + $0xbc] sm:$0xf] }
  0x5d   :  { %4239 = vst [vmem:[#allocation72_spill] sm:$0xff] %v3537_v0  ;;  %v2969_v40 = vld [vmem:[#allocation9 + $0x34] ss:$24 sps:$4 sm:$0xff]   ;;  %v2971_v42 = vld [vmem:[#allocation9 + $0x30] ss:$24 sps:$4 sm:$0xff]   ;;  %v2975_v44 = vld [vmem:[#allocation6] sm:$0xff]  }
  0x5e   :  { %310 = vmatprep.subr.bf16.mxu0 %v2969_v40  ;;  %2881 = vmatprep.subr.bf16.mxu1 %v2969_v40  ;;  %v2972_v35 = vld [vmem:[#allocation9 + $0x4] ss:$24 sps:$4 sm:$0xff]   ;;  %v2974_v37 = vld [vmem:[#allocation9] ss:$24 sps:$4 sm:$0xff]   ;;  %v4240_v40 = vmov 0   ;;  %v2984_v54 = vld [vmem:[#allocation6 + $0x28] sm:$0xff]  }
  0x5f   :  { %311 = vmatpush1.bf16.msra.mxu0 %v2971_v42  ;;  %2883 = vmatpush1.bf16.msra.mxu1 %v2971_v42  ;;  %v2976_v46 = vld [vmem:[#allocation6 + $0x20] sm:$0xff]   ;;  %v2977_v39 = vld [vmem:[#allocation9 + $0x38] ss:$24 sps:$4 sm:$0xff]   ;;  %v2979_v41 = vld [vmem:[#allocation9 + $0x3c] ss:$24 sps:$4 sm:$0xff]  }
  0x60   :  { %312 = vmatprep.subr.bf16.mxu0 %v2972_v35  ;;  %2882 = vmatprep.subr.bf16.mxu1 %v2972_v35  ;;  %v2980_v48 = vld [vmem:[#allocation9 + $0x40] ss:$24 sps:$4 sm:$0xff]   ;;  %v2982_v50 = vld [vmem:[#allocation9 + $0x44] ss:$24 sps:$4 sm:$0xff]   ;;  %v2983_v35 = vld [vmem:[#allocation6 + $0x8] sm:$0xff]  }
  0x61   :  { %v2987_v42 = vld [vmem:[#allocation9 + $0x8] ss:$24 sps:$4 sm:$0xff]   ;;  %v2989_v43 = vld [vmem:[#allocation9 + $0xc] ss:$24 sps:$4 sm:$0xff]  }
  0x62   :  { %v2990_v45 = vld [vmem:[#allocation9 + $0x10] ss:$24 sps:$4 sm:$0xff]   ;;  %v2992_v52 = vld [vmem:[#allocation9 + $0x14] ss:$24 sps:$4 sm:$0xff]  }
  0x63   :  { %313 = vmatpush1.bf16.msra.mxu0 %v2974_v37  ;;  %2884 = vmatpush1.bf16.msra.mxu1 %v2974_v37  ;;  %v2985_v37 = vld [vmem:[#allocation6 + $0x10] sm:$0xff]  }
  0x64   :  { %423 = vmatprep.subr.bf16.mxu1 %v2979_v41  ;;  %536 = vmatprep.subr.bf16.mxu0 %v2982_v50  ;;  %v2993_v41 = vld [vmem:[#allocation6 + $0x18] sm:$0xff]   ;;  %v973_v50 = vld [vmem:[%s4143_s7] sm:$0x7] }
  0x66   :  { %2527 = vmatmul.mubr.msk.bf16.vlgmr.msra.gmra.mxu0 %vm273_vm0, %v2975_v44  ;;  %2531 = vmatmul.mubr.msk.bf16.vlgmr.msra.gmra.mxu1 %vm273_vm0, %v2976_v46 }
  0x67   :  { %424 = vmatpush1.bf16.msra.mxu1 %v2977_v39  ;;  %537 = vmatpush1.bf16.msra.mxu0 %v2980_v48  ;;  %v2986_v39 = vld [vmem:[#allocation6 + $0x30] sm:$0xff]  }
  0x68   :  { %340 = vmatprep.mubr.bf16.mxu0 %v4240_v40  ;;  %380 = vmatprep.mubr.bf16.mxu1 %v4240_v40 }
  0x69   :  { %425 = vmatprep.subr.bf16.mxu1 %v2989_v43  ;;  %538 = vmatprep.subr.bf16.mxu0 %v2992_v52  ;;  %v2994_v43 = vld [vmem:[#allocation6 + $0x38] sm:$0xff]   ;;  %v990_v52 = vld [vmem:[%s4144_s8] sm:$0x7] }
  0x6b   :  { %426 = vmatpush1.bf16.msra.mxu1 %v2987_v42  ;;  %539 = vmatpush1.bf16.msra.mxu0 %v2990_v45 }
  0x6e   :  { %2528 = vmatmul.mubr.msk.bf16.gmra.mxu0 %vm273_vm0, %v2983_v35  ;;  %2532 = vmatmul.mubr.msk.bf16.gmra.mxu1 %vm273_vm0, %v2984_v54 }
  0x6f   :  { %350 = vmatprep.mubr.bf16.mxu0 %v4240_v40  ;;  %390 = vmatprep.mubr.bf16.mxu1 %v4240_v40 }
  0x76   :  { %2529 = vmatmul.mubr.msk.bf16.gmra.mxu0 %vm273_vm0, %v2985_v37  ;;  %2533 = vmatmul.mubr.msk.bf16.gmra.mxu1 %vm273_vm0, %v2986_v39 }
  0x77   :  { %360 = vmatprep.mubr.bf16.mxu0 %v4240_v40  ;;  %400 = vmatprep.mubr.bf16.mxu1 %v4240_v40 }
  0x7e   :  { %2530 = vmatmul.mubr.msk.bf16.gmra.mxu0 %vm273_vm0, %v2993_v41  ;;  %2534 = vmatmul.mubr.msk.bf16.gmra.mxu1 %vm273_vm0, %v2994_v43 }
  0x7f   :  { %443 = vmatprep.mubr.bf16.mxu1 %v4240_v40  ;;  %556 = vmatprep.mubr.bf16.mxu0 %v4240_v40 }
  0x86   :  { %2535 = vmatmul.mubr.msk.bf16.vlgmr.msra.gmra.mxu1 %vm273_vm0, %v2975_v44  ;;  %2543 = vmatmul.mubr.msk.bf16.vlgmr.msra.gmra.mxu0 %vm273_vm0, %v2975_v44  ;;  %v4157_v44 = vlaneseq }
  0x87   :  { %453 = vmatprep.mubr.bf16.mxu1 %v4240_v40  ;;  %566 = vmatprep.mubr.bf16.mxu0 %v4240_v40 }
  0x88   :  { %v3576_v45 = vshrl.u32 %v4157_v44, 7 }
  0x8a   :  { %v3581_v48 = vsub.s32 0, %v3576_v45  ;;  %v3598_v42 = vsub.s32 1, %v3576_v45  ;;  %v3617_v44 = vsub.s32 2, %v3576_v45 }
  0x8c   :  { %4241 = vst [vmem:[#allocation73_spill] sm:$0xff] %v3581_v48  ;;  %4244 = vst [vmem:[#allocation76_spill] sm:$0xff] %v3598_v42 }
  0x8d   :  { %4247 = vst [vmem:[#allocation79_spill] sm:$0xff] %v3617_v44 }
  0x8e   :  { %2536 = vmatmul.mubr.msk.bf16.gmra.mxu1 %vm273_vm0, %v2983_v35  ;;  %2544 = vmatmul.mubr.msk.bf16.gmra.mxu0 %vm273_vm0, %v2983_v35  ;;  %v3592_v35 = vrot.slane %v973_v50, %v3581_v48 }
  0x8f   :  { %463 = vmatprep.mubr.bf16.mxu1 %v4240_v40  ;;  %576 = vmatprep.mubr.bf16.mxu0 %v4240_v40 }
  0x90   :  { %4242 = vst [vmem:[#allocation74_spill] sm:$0xff] %v3592_v35 }
  0x96   :  { %2537 = vmatmul.mubr.msk.bf16.gmra.mxu1 %vm273_vm0, %v2985_v37  ;;  %2545 = vmatmul.mubr.msk.bf16.gmra.mxu0 %vm273_vm0, %v2985_v37  ;;  %v3601_v37 = vrot.slane %v973_v50, %v3598_v42 }
  0x97   :  { %473 = vmatprep.mubr.bf16.mxu1 %v4240_v40  ;;  %586 = vmatprep.mubr.bf16.mxu0 %v4240_v40 }
  0x98   :  { %4245 = vst [vmem:[#allocation77_spill] sm:$0xff] %v3601_v37 }
  0x9e   :  { %2538 = vmatmul.mubr.msk.bf16.gmra.mxu1 %vm273_vm0, %v2993_v41  ;;  %2546 = vmatmul.mubr.msk.bf16.gmra.mxu0 %vm273_vm0, %v2993_v41  ;;  %v3604_v41 = vrot.slane %v990_v52, %v3598_v42 }
  0x9f   :  { %483 = vmatprep.mubr.bf16.mxu1 %v4240_v40  ;;  %596 = vmatprep.mubr.bf16.mxu0 %v4240_v40 }
  0xa0   :  { %4246 = vst [vmem:[#allocation78_spill] sm:$0xff] %v3604_v41  ;;  %v3623_v41 = vrot.slane %v990_v52, %v3617_v44 }
  0xa2   :  { %4249 = vst [vmem:[#allocation81_spill] sm:$0xff] %v3623_v41 }
  0xa6   :  { %2539 = vmatmul.mubr.msk.bf16.gmra.mxu1 %vm273_vm0, %v2976_v46  ;;  %2547 = vmatmul.mubr.msk.bf16.gmra.mxu0 %vm273_vm0, %v2976_v46  ;;  %v3595_v46 = vrot.slane %v990_v52, %v3581_v48 }
  0xa7   :  { %493 = vmatprep.mubr.bf16.mxu1 %v4240_v40  ;;  %606 = vmatprep.mubr.bf16.mxu0 %v4240_v40 }
  0xa8   :  { %4243 = vst [vmem:[#allocation75_spill] sm:$0xff] %v3595_v46 }
  0xae   :  { %2540 = vmatmul.mubr.msk.bf16.gmra.mxu1 %vm273_vm0, %v2984_v54  ;;  %2548 = vmatmul.mubr.msk.bf16.gmra.mxu0 %vm273_vm0, %v2984_v54  ;;  %v3620_v54 = vrot.slane %v973_v50, %v3617_v44 }
  0xaf   :  { %503 = vmatprep.mubr.bf16.mxu1 %v4240_v40  ;;  %616 = vmatprep.mubr.bf16.mxu0 %v4240_v40 }
  0xb0   :  { %4248 = vst [vmem:[#allocation80_spill] sm:$0xff] %v3620_v54 }
  0xb6   :  { %2541 = vmatmul.mubr.msk.bf16.gmra.mxu1 %vm273_vm0, %v2986_v39  ;;  %2549 = vmatmul.mubr.msk.bf16.gmra.mxu0 %vm273_vm0, %v2986_v39  ;;  %v3628_v39 = vld [vmem:[%s4140_s4] sm:$0x3f] }
  0xb7   :  { %513 = vmatprep.mubr.bf16.mxu1 %v4240_v40  ;;  %626 = vmatprep.mubr.bf16.mxu0 %v4240_v40  ;;  %v3632_v40 = vrot.slane %v3628_v39, %v3581_v48 }
  0xbe   :  { %2542 = vmatmul.mubr.msk.bf16.gmra.mxu1 %vm273_vm0, %v2994_v43  ;;  %2550 = vmatmul.mubr.msk.bf16.gmra.mxu0 %vm273_vm0, %v2994_v43  ;;  %v3636_v43 = vrot.slane %v3628_v39, %v3598_v42 }
 0x126   :  { %v332_v46 = vpop.f32.mrf.mxu0  ;;  %v372_v37 = vpop.f32.mrf.mxu1 }
 0x127   :  { %v333_v52 = vadd.f32 %v332_v46, %v3632_v40  ;;  %v373_v41 = vadd.f32 %v372_v37, %v3632_v40 }
 0x128   :  { %v334_v50 = vpop.f32.mrf.mxu0  ;;  %v374_v54 = vpop.f32.mrf.mxu1 }
 0x129   :  { %v335_v35 = vadd.f32 %v334_v50, %v3636_v43  ;;  %v375_v47 = vadd.f32 %v374_v54, %v3636_v43 }
 0x12a   :  { %v336_v49 = vpop.f32.mrf.mxu0  ;;  %v376_v56 = vpop.f32.mrf.mxu1 }
 0x12b   :  { %v2702_v48 = vpack.c.bf16 %v335_v35, %v333_v52  ;;  %v2726_v58 = vpack.c.bf16 %v375_v47, %v373_v41  ;;  %v337_v42 = vadd.f32 %v336_v49, %v3632_v40  ;;  %v377_v60 = vadd.f32 %v376_v56, %v3632_v40 }
 0x12c   :  { %v338_v51 = vpop.f32.mrf.mxu0  ;;  %v378_v53 = vpop.f32.mrf.mxu1 }
 0x12d   :  { %925 = vst [vmem:[#allocation2] sm:$0xff] %v2702_v48  ;;  %949 = vst [vmem:[#allocation2 + $0xc0] sm:$0xff] %v2726_v58  ;;  %v339_v46 = vadd.f32 %v338_v51, %v3636_v43  ;;  %v379_v37 = vadd.f32 %v378_v53, %v3636_v43 }
 0x12e   :  { %v342_v62 = vpop.f32.mrf.mxu0  ;;  %v382_v50 = vpop.f32.mrf.mxu1 }
 0x12f   :  { %v2705_v55 = vpack.c.bf16 %v339_v46, %v337_v42  ;;  %v2729_v54 = vpack.c.bf16 %v379_v37, %v377_v60  ;;  %v343_v47 = vadd.f32 %v342_v62, %v3632_v40  ;;  %v383_v58 = vadd.f32 %v382_v50, %v3632_v40 }
 0x130   :  { %v344_v57 = vpop.f32.mrf.mxu0  ;;  %v384_v0 = vpop.f32.mrf.mxu1 }
 0x131   :  { %928 = vst [vmem:[#allocation2 + $0x18] sm:$0xff] %v2705_v55  ;;  %952 = vst [vmem:[#allocation2 + $0xd8] sm:$0xff] %v2729_v54  ;;  %v345_v49 = vadd.f32 %v344_v57, %v3636_v43  ;;  %v385_v56 = vadd.f32 %v384_v0, %v3636_v43 }
 0x132   :  { %v346_v48 = vpop.f32.mrf.mxu0  ;;  %v386_v51 = vpop.f32.mrf.mxu1 }
 0x133   :  { %v2708_v35 = vpack.c.bf16 %v345_v49, %v343_v47  ;;  %v2732_v53 = vpack.c.bf16 %v385_v56, %v383_v58  ;;  %v347_v60 = vadd.f32 %v346_v48, %v3632_v40  ;;  %v387_v55 = vadd.f32 %v386_v51, %v3632_v40 }
 0x134   :  { %v348_v41 = vpop.f32.mrf.mxu0  ;;  %v388_v52 = vpop.f32.mrf.mxu1 }
 0x135   :  { %931 = vst [vmem:[#allocation2 + $0x30] sm:$0xff] %v2708_v35  ;;  %955 = vst [vmem:[#allocation2 + $0xf0] sm:$0xff] %v2732_v53  ;;  %v349_v62 = vadd.f32 %v348_v41, %v3636_v43  ;;  %v389_v42 = vadd.f32 %v388_v52, %v3636_v43 }
 0x136   :  { %v352_v46 = vpop.f32.mrf.mxu0  ;;  %v392_v57 = vpop.f32.mrf.mxu1 }
 0x137   :  { %v2711_v37 = vpack.c.bf16 %v349_v62, %v347_v60  ;;  %v2735_v0 = vpack.c.bf16 %v389_v42, %v387_v55  ;;  %v353_v47 = vadd.f32 %v352_v46, %v3632_v40  ;;  %v393_v58 = vadd.f32 %v392_v57, %v3632_v40 }
 0x138   :  { %v354_v50 = vpop.f32.mrf.mxu0  ;;  %v394_v54 = vpop.f32.mrf.mxu1 }
 0x139   :  { %934 = vst [vmem:[#allocation2 + $0x48] sm:$0xff] %v2711_v37  ;;  %958 = vst [vmem:[#allocation2 + $0x108] sm:$0xff] %v2735_v0  ;;  %v355_v49 = vadd.f32 %v354_v50, %v3636_v43  ;;  %v395_v56 = vadd.f32 %v394_v54, %v3636_v43 }
 0x13a   :  { %v356_v48 = vpop.f32.mrf.mxu0  ;;  %v396_v51 = vpop.f32.mrf.mxu1 }
 0x13b   :  { %v2714_v35 = vpack.c.bf16 %v355_v49, %v353_v47  ;;  %v2738_v53 = vpack.c.bf16 %v395_v56, %v393_v58  ;;  %v357_v60 = vadd.f32 %v356_v48, %v3632_v40  ;;  %v397_v55 = vadd.f32 %v396_v51, %v3632_v40 }
 0x13c   :  { %v358_v41 = vpop.f32.mrf.mxu0  ;;  %v398_v52 = vpop.f32.mrf.mxu1  ;;  %v4174_v47 = vsub.s32 4, %v3576_v45  ;;  %v4173_v58 = vsub.s32 3, %v3576_v45  ;;  %v4176_v49 = vsub.s32 5, %v3576_v45 }
 0x13d   :  { %937 = vst [vmem:[#allocation2 + $0x60] sm:$0xff] %v2714_v35  ;;  %961 = vst [vmem:[#allocation2 + $0x120] sm:$0xff] %v2738_v53  ;;  %v359_v62 = vadd.f32 %v358_v41, %v3636_v43  ;;  %v399_v42 = vadd.f32 %v398_v52, %v3636_v43 }
 0x13e   :  { %v362_v46 = vpop.f32.mrf.mxu0  ;;  %v402_v57 = vpop.f32.mrf.mxu1 }
 0x13f   :  { %v2717_v37 = vpack.c.bf16 %v359_v62, %v357_v60  ;;  %v2741_v0 = vpack.c.bf16 %v399_v42, %v397_v55  ;;  %v363_v56 = vadd.f32 %v362_v46, %v3632_v40  ;;  %v403_v48 = vadd.f32 %v402_v57, %v3632_v40 }
 0x140   :  { %v364_v50 = vpop.f32.mrf.mxu0  ;;  %v404_v54 = vpop.f32.mrf.mxu1  ;;  %v3671_v42 = vrot.slane %v3628_v39, %v3617_v44  ;;  %v3676_v46 = vrot.slane %v3628_v39, %v4174_v47  ;;  %v3681_v57 = vrot.slane %v3628_v39, %v4173_v58 }
 0x141   :  { %940 = vst [vmem:[#allocation2 + $0x78] sm:$0xff] %v2717_v37  ;;  %964 = vst [vmem:[#allocation2 + $0x138] sm:$0xff] %v2741_v0  ;;  %v365_v51 = vadd.f32 %v364_v50, %v3636_v43  ;;  %v405_v35 = vadd.f32 %v404_v54, %v3636_v43  ;;  %v3686_v37 = vrot.slane %v3628_v39, %v4176_v49 }
 0x142   :  { %v366_v53 = vpop.f32.mrf.mxu0  ;;  %v406_v41 = vpop.f32.mrf.mxu1 }
 0x143   :  { %v2720_v52 = vpack.c.bf16 %v365_v51, %v363_v56  ;;  %v2744_v60 = vpack.c.bf16 %v405_v35, %v403_v48  ;;  %v367_v0 = vadd.f32 %v366_v53, %v3632_v40  ;;  %v407_v50 = vadd.f32 %v406_v41, %v3632_v40 }
 0x144   :  { %v368_v55 = vpop.f32.mrf.mxu0  ;;  %v408_v62 = vpop.f32.mrf.mxu1 }
 0x145   :  { %943 = vst [vmem:[#allocation2 + $0x90] sm:$0xff] %v2720_v52  ;;  %967 = vst [vmem:[#allocation2 + $0x150] sm:$0xff] %v2744_v60  ;;  %v369_v54 = vadd.f32 %v368_v55, %v3636_v43  ;;  %v409_v56 = vadd.f32 %v408_v62, %v3636_v43 }
 0x146   :  { %v445_v48 = vpop.f32.mrf.mxu1  ;;  %v558_v51 = vpop.f32.mrf.mxu0 }
 0x147   :  { %v2723_v35 = vpack.c.bf16 %v369_v54, %v367_v0  ;;  %v2747_v58 = vpack.c.bf16 %v409_v56, %v407_v50  ;;  %v446_v39 = vadd.f32 %v445_v48, %v3671_v42  ;;  %v559_v52 = vadd.f32 %v558_v51, %v3676_v46 }
 0x148   :  { %v447_v47 = vpop.f32.mrf.mxu1  ;;  %v560_v44 = vpop.f32.mrf.mxu0 }
 0x149   :  { %946 = vst [vmem:[#allocation2 + $0xa8] sm:$0xff] %v2723_v35  ;;  %970 = vst [vmem:[#allocation2 + $0x168] sm:$0xff] %v2747_v58  ;;  %v448_v53 = vadd.f32 %v447_v47, %v3681_v57  ;;  %v561_v40 = vadd.f32 %v560_v44, %v3686_v37 }
 0x14a   :  { %v449_v41 = vpop.f32.mrf.mxu1  ;;  %v562_v60 = vpop.f32.mrf.mxu0 }
 0x14b   :  { %v2703_v55 = vpack.c.bf16 %v448_v53, %v446_v39  ;;  %v2704_v43 = vpack.c.bf16 %v561_v40, %v559_v52  ;;  %v450_v0 = vadd.f32 %v449_v41, %v3671_v42  ;;  %v563_v58 = vadd.f32 %v562_v60, %v3676_v46 }
 0x14c   :  { %v451_v62 = vpop.f32.mrf.mxu1  ;;  %v564_v49 = vpop.f32.mrf.mxu0 }
 0x14d   :  { %926 = vst [vmem:[#allocation2 + $0x8] sm:$0xff] %v2703_v55  ;;  %927 = vst [vmem:[#allocation2 + $0x10] sm:$0xff] %v2704_v43  ;;  %v452_v50 = vadd.f32 %v451_v62, %v3681_v57  ;;  %v565_v54 = vadd.f32 %v564_v49, %v3686_v37 }
 0x14e   :  { %v455_v56 = vpop.f32.mrf.mxu1  ;;  %v568_v47 = vpop.f32.mrf.mxu0 }
 0x14f   :  { %v2706_v48 = vpack.c.bf16 %v452_v50, %v450_v0  ;;  %v2707_v44 = vpack.c.bf16 %v565_v54, %v563_v58  ;;  %v456_v39 = vadd.f32 %v455_v56, %v3671_v42  ;;  %v569_v52 = vadd.f32 %v568_v47, %v3676_v46 }
 0x150   :  { %v457_v51 = vpop.f32.mrf.mxu1  ;;  %v570_v35 = vpop.f32.mrf.mxu0 }
 0x151   :  { %929 = vst [vmem:[#allocation2 + $0x20] sm:$0xff] %v2706_v48  ;;  %930 = vst [vmem:[#allocation2 + $0x28] sm:$0xff] %v2707_v44  ;;  %v458_v53 = vadd.f32 %v457_v51, %v3681_v57  ;;  %v571_v40 = vadd.f32 %v570_v35, %v3686_v37 }
 0x152   :  { %v459_v41 = vpop.f32.mrf.mxu1  ;;  %v572_v60 = vpop.f32.mrf.mxu0 }
 0x153   :  { %v2709_v55 = vpack.c.bf16 %v458_v53, %v456_v39  ;;  %v2710_v49 = vpack.c.bf16 %v571_v40, %v569_v52  ;;  %v460_v0 = vadd.f32 %v459_v41, %v3671_v42  ;;  %v573_v58 = vadd.f32 %v572_v60, %v3676_v46 }
 0x154   :  { %v461_v43 = vpop.f32.mrf.mxu1  ;;  %v574_v62 = vpop.f32.mrf.mxu0 }
 0x155   :  { %932 = vst [vmem:[#allocation2 + $0x38] sm:$0xff] %v2709_v55  ;;  %933 = vst [vmem:[#allocation2 + $0x40] sm:$0xff] %v2710_v49  ;;  %v462_v50 = vadd.f32 %v461_v43, %v3681_v57  ;;  %v575_v54 = vadd.f32 %v574_v62, %v3686_v37 }
 0x156   :  { %v465_v56 = vpop.f32.mrf.mxu1  ;;  %v578_v47 = vpop.f32.mrf.mxu0 }
 0x157   :  { %v2712_v48 = vpack.c.bf16 %v462_v50, %v460_v0  ;;  %v2713_v44 = vpack.c.bf16 %v575_v54, %v573_v58  ;;  %v466_v39 = vadd.f32 %v465_v56, %v3671_v42  ;;  %v579_v52 = vadd.f32 %v578_v47, %v3676_v46 }
 0x158   :  { %v467_v51 = vpop.f32.mrf.mxu1  ;;  %v580_v35 = vpop.f32.mrf.mxu0 }
 0x159   :  { %935 = vst [vmem:[#allocation2 + $0x50] sm:$0xff] %v2712_v48  ;;  %936 = vst [vmem:[#allocation2 + $0x58] sm:$0xff] %v2713_v44  ;;  %v468_v53 = vadd.f32 %v467_v51, %v3681_v57  ;;  %v581_v40 = vadd.f32 %v580_v35, %v3686_v37 }
 0x15a   :  { %v469_v41 = vpop.f32.mrf.mxu1  ;;  %v582_v60 = vpop.f32.mrf.mxu0 }
 0x15b   :  { %v2715_v55 = vpack.c.bf16 %v468_v53, %v466_v39  ;;  %v2716_v49 = vpack.c.bf16 %v581_v40, %v579_v52  ;;  %v470_v0 = vadd.f32 %v469_v41, %v3671_v42  ;;  %v583_v58 = vadd.f32 %v582_v60, %v3676_v46 }
 0x15c   :  { %v471_v43 = vpop.f32.mrf.mxu1  ;;  %v584_v62 = vpop.f32.mrf.mxu0 }
 0x15d   :  { %938 = vst [vmem:[#allocation2 + $0x68] sm:$0xff] %v2715_v55  ;;  %939 = vst [vmem:[#allocation2 + $0x70] sm:$0xff] %v2716_v49  ;;  %v472_v50 = vadd.f32 %v471_v43, %v3681_v57  ;;  %v585_v54 = vadd.f32 %v584_v62, %v3686_v37 }
 0x15e   :  { %v475_v56 = vpop.f32.mrf.mxu1  ;;  %v588_v47 = vpop.f32.mrf.mxu0 }
 0x15f   :  { %v2718_v48 = vpack.c.bf16 %v472_v50, %v470_v0  ;;  %v2719_v44 = vpack.c.bf16 %v585_v54, %v583_v58  ;;  %v476_v39 = vadd.f32 %v475_v56, %v3671_v42  ;;  %v589_v52 = vadd.f32 %v588_v47, %v3676_v46 }
 0x160   :  { %v477_v51 = vpop.f32.mrf.mxu1  ;;  %v590_v35 = vpop.f32.mrf.mxu0 }
 0x161   :  { %941 = vst [vmem:[#allocation2 + $0x80] sm:$0xff] %v2718_v48  ;;  %942 = vst [vmem:[#allocation2 + $0x88] sm:$0xff] %v2719_v44  ;;  %v478_v53 = vadd.f32 %v477_v51, %v3681_v57  ;;  %v591_v40 = vadd.f32 %v590_v35, %v3686_v37 }
 0x162   :  { %v479_v41 = vpop.f32.mrf.mxu1  ;;  %v592_v60 = vpop.f32.mrf.mxu0 }
 0x163   :  { %v2721_v55 = vpack.c.bf16 %v478_v53, %v476_v39  ;;  %v2722_v49 = vpack.c.bf16 %v591_v40, %v589_v52  ;;  %v480_v0 = vadd.f32 %v479_v41, %v3671_v42  ;;  %v593_v58 = vadd.f32 %v592_v60, %v3676_v46 }
 0x164   :  { %v481_v43 = vpop.f32.mrf.mxu1  ;;  %v594_v62 = vpop.f32.mrf.mxu0 }
 0x165   :  { %944 = vst [vmem:[#allocation2 + $0x98] sm:$0xff] %v2721_v55  ;;  %945 = vst [vmem:[#allocation2 + $0xa0] sm:$0xff] %v2722_v49  ;;  %v482_v50 = vadd.f32 %v481_v43, %v3681_v57  ;;  %v595_v54 = vadd.f32 %v594_v62, %v3686_v37 }
 0x166   :  { %v485_v56 = vpop.f32.mrf.mxu1  ;;  %v598_v47 = vpop.f32.mrf.mxu0 }
 0x167   :  { %v2724_v48 = vpack.c.bf16 %v482_v50, %v480_v0  ;;  %v2725_v44 = vpack.c.bf16 %v595_v54, %v593_v58  ;;  %v486_v39 = vadd.f32 %v485_v56, %v3671_v42  ;;  %v599_v52 = vadd.f32 %v598_v47, %v3676_v46 }
 0x168   :  { %v487_v51 = vpop.f32.mrf.mxu1  ;;  %v600_v35 = vpop.f32.mrf.mxu0 }
 0x169   :  { %947 = vst [vmem:[#allocation2 + $0xb0] sm:$0xff] %v2724_v48  ;;  %948 = vst [vmem:[#allocation2 + $0xb8] sm:$0xff] %v2725_v44  ;;  %v488_v53 = vadd.f32 %v487_v51, %v3681_v57  ;;  %v601_v40 = vadd.f32 %v600_v35, %v3686_v37 }
 0x16a   :  { %v489_v41 = vpop.f32.mrf.mxu1  ;;  %v602_v60 = vpop.f32.mrf.mxu0 }
 0x16b   :  { %v2727_v55 = vpack.c.bf16 %v488_v53, %v486_v39  ;;  %v2728_v49 = vpack.c.bf16 %v601_v40, %v599_v52  ;;  %v490_v0 = vadd.f32 %v489_v41, %v3671_v42  ;;  %v603_v58 = vadd.f32 %v602_v60, %v3676_v46 }
 0x16c   :  { %v491_v43 = vpop.f32.mrf.mxu1  ;;  %v604_v62 = vpop.f32.mrf.mxu0 }
 0x16d   :  { %950 = vst [vmem:[#allocation2 + $0xc8] sm:$0xff] %v2727_v55  ;;  %951 = vst [vmem:[#allocation2 + $0xd0] sm:$0xff] %v2728_v49  ;;  %v492_v50 = vadd.f32 %v491_v43, %v3681_v57  ;;  %v605_v54 = vadd.f32 %v604_v62, %v3686_v37 }
 0x16e   :  { %v495_v56 = vpop.f32.mrf.mxu1  ;;  %v608_v47 = vpop.f32.mrf.mxu0 }
 0x16f   :  { %v2730_v48 = vpack.c.bf16 %v492_v50, %v490_v0  ;;  %v2731_v44 = vpack.c.bf16 %v605_v54, %v603_v58  ;;  %v496_v39 = vadd.f32 %v495_v56, %v3671_v42  ;;  %v609_v52 = vadd.f32 %v608_v47, %v3676_v46 }
 0x170   :  { %v497_v51 = vpop.f32.mrf.mxu1  ;;  %v610_v35 = vpop.f32.mrf.mxu0 }
 0x171   :  { %953 = vst [vmem:[#allocation2 + $0xe0] sm:$0xff] %v2730_v48  ;;  %954 = vst [vmem:[#allocation2 + $0xe8] sm:$0xff] %v2731_v44  ;;  %v498_v53 = vadd.f32 %v497_v51, %v3681_v57  ;;  %v611_v40 = vadd.f32 %v610_v35, %v3686_v37 }
 0x172   :  { %v499_v41 = vpop.f32.mrf.mxu1  ;;  %v612_v60 = vpop.f32.mrf.mxu0 }
 0x173   :  { %v2733_v55 = vpack.c.bf16 %v498_v53, %v496_v39  ;;  %v2734_v49 = vpack.c.bf16 %v611_v40, %v609_v52  ;;  %v500_v0 = vadd.f32 %v499_v41, %v3671_v42  ;;  %v613_v58 = vadd.f32 %v612_v60, %v3676_v46 }
 0x174   :  { %v501_v43 = vpop.f32.mrf.mxu1  ;;  %v614_v62 = vpop.f32.mrf.mxu0 }
 0x175   :  { %956 = vst [vmem:[#allocation2 + $0xf8] sm:$0xff] %v2733_v55  ;;  %957 = vst [vmem:[#allocation2 + $0x100] sm:$0xff] %v2734_v49  ;;  %v502_v50 = vadd.f32 %v501_v43, %v3681_v57  ;;  %v615_v54 = vadd.f32 %v614_v62, %v3686_v37 }
 0x176   :  { %v505_v56 = vpop.f32.mrf.mxu1  ;;  %v618_v47 = vpop.f32.mrf.mxu0 }
 0x177   :  { %v2736_v48 = vpack.c.bf16 %v502_v50, %v500_v0  ;;  %v2737_v44 = vpack.c.bf16 %v615_v54, %v613_v58  ;;  %v506_v39 = vadd.f32 %v505_v56, %v3671_v42  ;;  %v619_v52 = vadd.f32 %v618_v47, %v3676_v46 }
 0x178   :  { %v507_v51 = vpop.f32.mrf.mxu1  ;;  %v620_v35 = vpop.f32.mrf.mxu0 }
 0x179   :  { %959 = vst [vmem:[#allocation2 + $0x110] sm:$0xff] %v2736_v48  ;;  %960 = vst [vmem:[#allocation2 + $0x118] sm:$0xff] %v2737_v44  ;;  %v508_v53 = vadd.f32 %v507_v51, %v3681_v57  ;;  %v621_v40 = vadd.f32 %v620_v35, %v3686_v37 }
 0x17a   :  { %v509_v41 = vpop.f32.mrf.mxu1  ;;  %v622_v60 = vpop.f32.mrf.mxu0 }
 0x17b   :  { %v2739_v55 = vpack.c.bf16 %v508_v53, %v506_v39  ;;  %v2740_v49 = vpack.c.bf16 %v621_v40, %v619_v52  ;;  %v510_v0 = vadd.f32 %v509_v41, %v3671_v42  ;;  %v623_v58 = vadd.f32 %v622_v60, %v3676_v46 }
 0x17c   :  { %v511_v43 = vpop.f32.mrf.mxu1  ;;  %v624_v62 = vpop.f32.mrf.mxu0 }
 0x17d   :  { %962 = vst [vmem:[#allocation2 + $0x128] sm:$0xff] %v2739_v55  ;;  %963 = vst [vmem:[#allocation2 + $0x130] sm:$0xff] %v2740_v49  ;;  %v512_v50 = vadd.f32 %v511_v43, %v3681_v57  ;;  %v625_v54 = vadd.f32 %v624_v62, %v3686_v37 }
 0x17e   :  { %v515_v56 = vpop.f32.mrf.mxu1  ;;  %v628_v47 = vpop.f32.mrf.mxu0 }
 0x17f   :  { %v2742_v48 = vpack.c.bf16 %v512_v50, %v510_v0  ;;  %v2743_v44 = vpack.c.bf16 %v625_v54, %v623_v58  ;;  %v516_v39 = vadd.f32 %v515_v56, %v3671_v42  ;;  %v629_v52 = vadd.f32 %v628_v47, %v3676_v46 }
 0x180   :  { %v517_v51 = vpop.f32.mrf.mxu1  ;;  %v630_v35 = vpop.f32.mrf.mxu0 }
 0x181   :  { %965 = vst [vmem:[#allocation2 + $0x140] sm:$0xff] %v2742_v48  ;;  %966 = vst [vmem:[#allocation2 + $0x148] sm:$0xff] %v2743_v44  ;;  %v518_v53 = vadd.f32 %v517_v51, %v3681_v57  ;;  %v631_v40 = vadd.f32 %v630_v35, %v3686_v37 }
 0x182   :  { %v519_v41 = vpop.f32.mrf.mxu1  ;;  %v632_v60 = vpop.f32.mrf.mxu0 }
 0x183   :  { %v2745_v55 = vpack.c.bf16 %v518_v53, %v516_v39  ;;  %v2746_v49 = vpack.c.bf16 %v631_v40, %v629_v52  ;;  %v520_v0 = vadd.f32 %v519_v41, %v3671_v42  ;;  %v633_v58 = vadd.f32 %v632_v60, %v3676_v46 }
 0x184   :  { %v521_v43 = vpop.f32.mrf.mxu1  ;;  %v634_v62 = vpop.f32.mrf.mxu0 }
 0x185   :  { %968 = vst [vmem:[#allocation2 + $0x158] sm:$0xff] %v2745_v55  ;;  %969 = vst [vmem:[#allocation2 + $0x160] sm:$0xff] %v2746_v49  ;;  %v522_v50 = vadd.f32 %v521_v43, %v3681_v57  ;;  %v635_v54 = vadd.f32 %v634_v62, %v3686_v37  ;;  %2491 = sbr.rel (%p2599_p11) target bundleno = 722 (0x2d2), region = 101 }
 0x187   :  { %v2748_v56 = vpack.c.bf16 %v522_v50, %v520_v0  ;;  %v2749_v47 = vpack.c.bf16 %v635_v54, %v633_v58 }
 0x189   :  { %971 = vst [vmem:[#allocation2 + $0x170] sm:$0xff] %v2748_v56  ;;  %972 = vst [vmem:[#allocation2 + $0x178] sm:$0xff] %v2749_v47 }
 0x18a   :  { %v3759_v48 = vmov 0.0   ;;  %v3761_v44 = vmov 0.0   ;;  %v3763_v42 = vmov 0.0   ;;  %v3765_v46 = vmov 0.0  }
 0x18b LB: > { %v4250_v25 = vld [vmem:[#allocation45_spill] sm:$0xff]  ;;  %v4251_v23 = vld [vmem:[#allocation43_spill] sm:$0xff]  ;;  %v2625_v57 = vcombine.high %v3471_v31, %v3475_v33  ;;  %v2624_v37 = vcombine.low %v3471_v31, %v3475_v33  ;;  %v2622_v51 = vcombine.high %v3463_v27, %v3467_v29  ;;  %v2621_v35 = vcombine.low %v3463_v27, %v3467_v29  ;;  %s2600_s21 = sadd.s32 4294967295, %s4136_s0  ;;  %v4262_v24 = vld [vmem:[#allocation44_spill] sm:$0xff]  ;;  %s2750_s23 = smul.u32 48, %s3297_s3  ;;  %v3285_v44 = vphi %v3761_v44, %v1685_v44   ;;  %v3281_v48 = vphi %v3759_v48, %v1686_v48   ;;  %s3297_s3 = sphi %s3767_s3, %s1074_s3   ;;  %v3293_v46 = vphi %v3765_v46, %v1683_v46   ;;  %v3289_v42 = vphi %v3763_v42, %v1684_v42  }
 0x18c   : > { %v4252_v21 = vld [vmem:[#allocation41_spill] sm:$0xff]  ;;  %v4253_v19 = vld [vmem:[#allocation39_spill] sm:$0xff]  ;;  %v2619_v39 = vcombine.high %v4251_v23, %v4250_v25  ;;  %v3315_v52 = vmov 0.0   ;;  %v2626_v53 = vcombine.low %v3473_v32, %v3477_v34  ;;  %v3316_v40 = vmov 0   ;;  %s3820_s22 = ssub.s32 %s2600_s21, %s3297_s3  ;;  %v4263_v22 = vld [vmem:[#allocation42_spill] sm:$0xff]  ;;  %s2754_s6 = sshll.u32 %s3297_s3, 4 }
 0x18d   : > { %v4254_v17 = vld [vmem:[#allocation37_spill] sm:$0xff]  ;;  %v4255_v15 = vld [vmem:[#allocation35_spill] sm:$0xff]  ;;  %1226 = vmatprep.subr.bf16.mxu0 %v2625_v57  ;;  %2841 = vmatprep.subr.bf16.mxu1 %v3315_v52  ;;  %v2623_v41 = vcombine.low %v3465_v28, %v3469_v30  ;;  %v2618_v60 = vcombine.low %v4251_v23, %v4250_v25  ;;  %v2616_v55 = vcombine.high %v4253_v19, %v4252_v21  ;;  %vm3317_vm1 = vmmov 0   ;;  %v4264_v20 = vld [vmem:[#allocation40_spill] sm:$0xff]  ;;  %s3925_s24 = scalar_lea.vmem [#allocation2], %s2750_s23  ;;  %s2751_s25 = smul.u32 48, %s3820_s22 }
 0x18e   : > { %v4256_v13 = vld [vmem:[#allocation33_spill] sm:$0xff]  ;;  %v4257_v11 = vld [vmem:[#allocation31_spill] sm:$0xff]  ;;  %1227 = vmatpush1.bf16.msra.mxu0 %v2624_v37  ;;  %1258 = vmatprep.mubr.bf16.mxu0 %v3316_v40  ;;  %v2620_v49 = vcombine.low %v4262_v24, %v3461_v26  ;;  %v2615_v43 = vcombine.low %v4253_v19, %v4252_v21  ;;  %v2613_v62 = vcombine.high %v4255_v15, %v4254_v17  ;;  %v1627_v50 = vstv %s3297_s3  ;;  %v4265_v18 = vld [vmem:[#allocation38_spill] sm:$0xff]  ;;  %s1655_s27 = scalar_lea.vmem [#allocation3], %s2754_s6  ;;  %s2757_s28 = sshll.u32 %s3820_s22, 4 }
 0x18f   : > { %v4258_v9 = vld [vmem:[#allocation29_spill] sm:$0xff]  ;;  %v4259_v7 = vld [vmem:[#allocation27_spill] sm:$0xff]  ;;  %1228 = vmatprep.subr.bf16.mxu0 %v2622_v51  ;;  %2995 = vset.pattern.permute.xlu0 %v3316_v40  ;;  %v2617_v0 = vcombine.low %v4264_v20, %v4263_v22  ;;  %v2612_v58 = vcombine.low %v4255_v15, %v4254_v17  ;;  %v1630_v54 = vstv %s3820_s22  ;;  %v2610_v56 = vcombine.high %v4257_v11, %v4256_v13  ;;  %v4266_v16 = vld [vmem:[#allocation36_spill] sm:$0xff]  ;;  %s3934_s26 = scalar_lea.vmem [#allocation2], %s2751_s25  ;;  %s1680_s29 = scalar_lea.vmem [#allocation3], %s2757_s28 }
 0x190   : > { %v4260_v5 = vld [vmem:[#allocation25_spill] sm:$0xff]  ;;  %v4261_v3 = vld [vmem:[#allocation23_spill] sm:$0xff]  ;;  %2842 = vmatpush3.bf16.msra.mxu1 %v2626_v53  ;;  %2996 = vset.pattern.permute.xlu1 %v3316_v40  ;;  %vm1628_vm2 = vcmp.lt.s32.totalorder %v1627_v50, %v3408_v1  ;;  %vm1629_vm3 = vcmp.lt.s32.totalorder %v1627_v50, %v3413_v2  ;;  %vm1631_vm4 = vcmp.lt.s32.totalorder %v1630_v54, %v3408_v1  ;;  %v4267_v14 = vld [vmem:[#allocation34_spill] sm:$0xff]  ;;  %s1074_s3 = sadd.s32 1, %s3297_s3  }
 0x191   : > { %2843 = vmatprep.subr.bf16.mxu1 %v3315_v52  ;;  %2857 = vmatprep.mubr.msk.bf16.mxu1 %vm3317_vm1, %v3315_v52  ;;  %v1633_v47 = vsel %vm1628_vm2, 1, %v3316_v40  ;;  %v1658_v57 = vsel %vm1631_vm4, 1, %v3316_v40  ;;  %v2614_v37 = vcombine.low %v4266_v16, %v4265_v18  ;;  %vm1632_vm5 = vcmp.lt.s32.totalorder %v1630_v54, %v3413_v2  ;;  %v4268_v12 = vld [vmem:[#allocation32_spill] sm:$0xff]  ;;  %v4269_v10 = vld [vmem:[#allocation30_spill] sm:$0xff]  ;;  %p1073_p12 = scmp.ge.s32.totalorder %s1074_s3, %s4136_s0 }
 0x192   : > { %1229 = vmatpush1.bf16.msra.mxu0 %v2621_v35  ;;  %1636 = vperm.xlu0 %2995, %v1633_v47   ;;  %v2609_v51 = vcombine.low %v4257_v11, %v4256_v13  ;;  %v1634_v35 = vsel %vm1629_vm3, 1, %v3316_v40  ;;  %v1659_v53 = vsel %vm1632_vm5, 1, %v3316_v40  ;;  %v4270_v8 = vld [vmem:[#allocation28_spill] sm:$0xff]  ;;  %v4271_v6 = vld [vmem:[#allocation26_spill] sm:$0xff]  ;;  %v2648_v50 = vcombine.low %v3535_v63, %v3539_v36 }
 0x193   : > { %1230 = vmatprep.subr.bf16.mxu0 %v2619_v39  ;;  %v2607_v39 = vcombine.high %v4259_v7, %v4258_v9  ;;  %1661 = vperm.xlu1 %2996, %v1658_v57   ;;  %v4272_v4 = vld [vmem:[#allocation24_spill] sm:$0xff]  ;;  %v2646_v54 = vcombine.high %v3527_v59, %v3531_v61  ;;  %v2645_v57 = vcombine.low %v3527_v59, %v3531_v61 }
 0x194   : > { %2844 = vmatpush3.bf16.msra.mxu1 %v2623_v41  ;;  %v2611_v41 = vcombine.low %v4268_v12, %v4267_v14  ;;  %v4301_v14 = vld [vmem:[#allocation77_spill] sm:$0xff] }
 0x195   : > { %2845 = vmatprep.subr.bf16.mxu1 %v3315_v52 }
 0x196   : > { %1231 = vmatpush1.bf16.msra.mxu0 %v2618_v60  ;;  %1639 = vperm.xlu0 %2995, %v1634_v35   ;;  %v2606_v60 = vcombine.low %v4259_v7, %v4258_v9 }
 0x197   : > { %1232 = vmatprep.subr.bf16.mxu0 %v2616_v55  ;;  %v2604_v55 = vcombine.high %v4261_v3, %v4260_v5  ;;  %1664 = vperm.xlu1 %2996, %v1659_v53   ;;  %v4277_v53 = vld [vmem:[#allocation70_spill] sm:$0xff] }
 0x198   : > { %2846 = vmatpush3.bf16.msra.mxu1 %v2620_v49  ;;  %v2608_v49 = vcombine.low %v4270_v8, %v4269_v10 }
 0x199   : > { %2847 = vmatprep.subr.bf16.mxu1 %v3315_v52 }
 0x19a   : > { %1233 = vmatpush1.bf16.msra.mxu0 %v2615_v43  ;;  %v2603_v43 = vcombine.low %v4261_v3, %v4260_v5  ;;  %v4292_v3 = vld [vmem:[#allocation57_spill] sm:$0xff]  ;;  %v4297_v5 = vld [vmem:[#allocation51_spill] sm:$0xff] }
 0x19b   : > { %1234 = vmatprep.subr.bf16.mxu0 %v2613_v62  ;;  %v2649_v62 = vcombine.high %v3535_v63, %v3539_v36 }
 0x19c   : > { %2848 = vmatpush3.bf16.msra.mxu1 %v2617_v0  ;;  %v1097_v0 = vpack.c.bf16 %v3289_v42, %v3293_v46 }
 0x19d   : > { %2849 = vmatprep.subr.bf16.mxu1 %v3315_v52 }
 0x19e   : > { %1235 = vmatpush1.bf16.msra.mxu0 %v2612_v58  ;;  %v2605_v58 = vcombine.low %v4272_v4, %v4271_v6 }
 0x19f   : > { %1236 = vmatprep.subr.bf16.mxu0 %v2610_v56  ;;  %v4273_v56 = vld [vmem:[#allocation72_spill] sm:$0xff] }
 0x1a0   : > { %2850 = vmatpush3.bf16.msra.mxu1 %v2614_v37  ;;  %v2650_v47 = vcombine.low %v4273_v56, %v3541_v38  ;;  %v4274_v37 = vld [vmem:[#allocation68_spill] sm:$0xff] }
 0x1a1   : > { %2851 = vmatprep.subr.bf16.mxu1 %v3315_v52 }
 0x1a2   : > { %1237 = vmatpush1.bf16.msra.mxu0 %v2609_v51  ;;  %v4275_v51 = vld [vmem:[#allocation66_spill] sm:$0xff] }
 0x1a3   : > { %1238 = vmatprep.subr.bf16.mxu0 %v2607_v39  ;;  %v2643_v35 = vcombine.high %v4275_v51, %v4274_v37  ;;  %v4276_v39 = vld [vmem:[#allocation71_spill] sm:$0xff] }
 0x1a4   : > { %2852 = vmatpush3.bf16.msra.mxu1 %v2611_v41  ;;  %v2647_v41 = vcombine.low %v4277_v53, %v4276_v39  ;;  %v4286_v53 = vld [vmem:[#allocation56_spill] sm:$0xff] }
 0x1a5   : > { %2853 = vmatprep.subr.bf16.mxu1 %v3315_v52 }
 0x1a6   : > { %1239 = vmatpush1.bf16.msra.mxu0 %v2606_v60  ;;  %v2642_v60 = vcombine.low %v4275_v51, %v4274_v37 }
 0x1a7   : > { %1240 = vmatprep.subr.bf16.mxu0 %v2604_v55  ;;  %v4278_v55 = vld [vmem:[#allocation64_spill] sm:$0xff] }
 0x1a8   : > { %2854 = vmatpush3.bf16.msra.mxu1 %v2608_v49  ;;  %v4279_v49 = vld [vmem:[#allocation62_spill] sm:$0xff] }
 0x1a9   : > { %2855 = vmatprep.subr.bf16.mxu1 %v3315_v52 }
 0x1aa   : > { %1241 = vmatpush1.bf16.msra.mxu0 %v2603_v43  ;;  %v2640_v43 = vcombine.high %v4279_v49, %v4278_v55 }
 0x1ab   : > { %1439 = vmatprep.subr.bf16.mxu0 %v2649_v62  ;;  %v4281_v62 = vld [vmem:[#allocation67_spill] sm:$0xff] }
 0x1ac   : > { %2856 = vmatpush3.bf16.msra.mxu1 %v2605_v58  ;;  %v2639_v58 = vcombine.low %v4279_v49, %v4278_v55 }
 0x1ad   : > { %1259 = vmatmul.mubr.bf16.vlgmr.msra.gmra.mxu0 %v1097_v0  ;;  %2861 = vmatprep.subr.bf16.mxu1 %v3315_v52 }
 0x1ae   : > { %1440 = vmatpush1.bf16.msra.mxu0 %v2648_v50  ;;  %1471 = vmatprep.mubr.bf16.mxu0 %v3316_v40  ;;  %v4280_v40 = vld [vmem:[#allocation69_spill] sm:$0xff]  ;;  %v4282_v50 = vld [vmem:[#allocation60_spill] sm:$0xff] }
 0x1af   : > { %1441 = vmatprep.subr.bf16.mxu0 %v2646_v54  ;;  %2858 = vmatmul.mubr.bf16.vlgmr.msra.gmra.mxu1 %v1097_v0  ;;  %v2644_v0 = vcombine.low %v4281_v62, %v4280_v40  ;;  %v4283_v54 = vld [vmem:[#allocation58_spill] sm:$0xff]  ;;  %v4288_v40 = vld [vmem:[#allocation61_spill] sm:$0xff] }
 0x1b0   : > { %2862 = vmatpush3.bf16.msra.mxu1 %v2650_v47  ;;  %2877 = vmatprep.mubr.msk.bf16.mxu1 %vm3317_vm1, %v3315_v52  ;;  %v2637_v56 = vcombine.high %v4283_v54, %v4282_v50  ;;  %v4284_v47 = vld [vmem:[#allocation65_spill] sm:$0xff]  ;;  %v2636_v39 = vcombine.low %v4283_v54, %v4282_v50 }
 0x1b1   : > { %2863 = vmatprep.subr.bf16.mxu1 %v3315_v52 }
 0x1b2   : > { %1442 = vmatpush1.bf16.msra.mxu0 %v2645_v57  ;;  %v4285_v57 = vld [vmem:[#allocation63_spill] sm:$0xff] }
 0x1b3   : > { %1443 = vmatprep.subr.bf16.mxu0 %v2643_v35  ;;  %v2641_v35 = vcombine.low %v4285_v57, %v4284_v47  ;;  %v4291_v47 = vld [vmem:[#allocation50_spill] sm:$0xff] }
 0x1b4   : > { %2864 = vmatpush3.bf16.msra.mxu1 %v2647_v41  ;;  %v4287_v41 = vld [vmem:[#allocation54_spill] sm:$0xff] }
 0x1b5   : > { %2865 = vmatprep.subr.bf16.mxu1 %v3315_v52 }
 0x1b6   : > { %1444 = vmatpush1.bf16.msra.mxu0 %v2642_v60  ;;  %v2634_v60 = vcombine.high %v4287_v41, %v4286_v53 }
 0x1b7   : > { %1445 = vmatprep.subr.bf16.mxu0 %v2640_v43  ;;  %v4289_v43 = vld [vmem:[#allocation59_spill] sm:$0xff] }
 0x1b8   : > { %2866 = vmatpush3.bf16.msra.mxu1 %v2644_v0  ;;  %v2638_v62 = vcombine.low %v4289_v43, %v4288_v40  ;;  %v2633_v0 = vcombine.low %v4287_v41, %v4286_v53  ;;  %v4295_v40 = vld [vmem:[#allocation46_spill] sm:$0xff] }
 0x1b9   : > { %2867 = vmatprep.subr.bf16.mxu1 %v3315_v52 }
 0x1ba   : > { %1446 = vmatpush1.bf16.msra.mxu0 %v2639_v58  ;;  %v4290_v58 = vld [vmem:[#allocation52_spill] sm:$0xff] }
 0x1bb   : > { %1447 = vmatprep.subr.bf16.mxu0 %v2637_v56  ;;  %v2631_v57 = vcombine.high %v4291_v47, %v4290_v58  ;;  %v4293_v56 = vld [vmem:[#allocation55_spill] sm:$0xff] }
 0x1bc   : > { %2868 = vmatpush3.bf16.msra.mxu1 %v2641_v35  ;;  %v2635_v4 = vcombine.low %v4293_v56, %v4292_v3  ;;  %v2630_v35 = vcombine.low %v4291_v47, %v4290_v58  ;;  %v1310_v3 = vpack.c.bf16 %v3281_v48, %v3285_v44 }
 0x1bd   : > { %2869 = vmatprep.subr.bf16.mxu1 %v3315_v52 }
 0x1be   : > { %1448 = vmatpush1.bf16.msra.mxu0 %v2636_v39  ;;  %v4294_v39 = vld [vmem:[#allocation48_spill] sm:$0xff] }
 0x1bf   : > { %1449 = vmatprep.subr.bf16.mxu0 %v2634_v60  ;;  %v2628_v43 = vcombine.high %v4295_v40, %v4294_v39  ;;  %v4296_v60 = vld [vmem:[#allocation53_spill] sm:$0xff] }
 0x1c0   : > { %2870 = vmatpush3.bf16.msra.mxu1 %v2638_v62  ;;  %v2632_v6 = vcombine.low %v4297_v5, %v4296_v60  ;;  %v2627_v62 = vcombine.low %v4295_v40, %v4294_v39  ;;  %v4300_v60 = vld [vmem:[#allocation74_spill] sm:$0xff] }
 0x1c1   : > { %2871 = vmatprep.subr.bf16.mxu1 %v3315_v52 }
 0x1c2   : > { %1450 = vmatpush1.bf16.msra.mxu0 %v2633_v0  ;;  %v4298_v0 = vld [vmem:[#allocation49_spill] sm:$0xff] }
 0x1c3   : > { %1451 = vmatprep.subr.bf16.mxu0 %v2631_v57  ;;  %v4299_v57 = vld [vmem:[#allocation47_spill] sm:$0xff] }
 0x1c4   : > { %2872 = vmatpush3.bf16.msra.mxu1 %v2635_v4  ;;  %v2629_v56 = vcombine.low %v4299_v57, %v4298_v0  ;;  %v1086_v4 = vld [vmem:[%s3925_s24] sm:$0xff] }
 0x1c5   : > { %2873 = vmatprep.subr.bf16.mxu1 %v3315_v52  ;;  %v1523_v5 = vunpack.c.l.bf16 %v1086_v4  ;;  %v1541_v9 = vrot.slane %v1086_v4, 4 }
 0x1c6   : > { %1452 = vmatpush1.bf16.msra.mxu0 %v2630_v35 }
 0x1c7   : > { %1453 = vmatprep.subr.bf16.mxu0 %v2628_v43  ;;  %v1088_v43 = vld [vmem:[%s3925_s24 + $0x18] sm:$0xff]  ;;  %v1545_v16 = vunpack.c.l.bf16 %v1541_v9 }
 0x1c8   : > { %2874 = vmatpush3.bf16.msra.mxu1 %v2632_v6  ;;  %v1524_v0 = vunpack.c.l.bf16 %v1088_v43 }
 0x1c9   : > { %2875 = vmatprep.subr.bf16.mxu1 %v3315_v52 }
 0x1ca   : > { %1454 = vmatpush1.bf16.msra.mxu0 %v2627_v62 }
 0x1cc   : > { %2876 = vmatpush3.bf16.msra.mxu1 %v2629_v56 }
 0x1cd   : > { %1472 = vmatmul.mubr.bf16.vlgmr.msra.gmra.mxu0 %v1310_v3 }
 0x1cf   : > { %2878 = vmatmul.mubr.bf16.vlgmr.msra.gmra.mxu1 %v1310_v3 }
 0x26d   : > { %v1260_v35 = vpop.f32.mrf.mxu0 }
 0x26e   : > { %v1261_v6 = vadd.f32 %v1260_v35, %v4300_v60  ;;  %v1542_v35 = vrot.slane %v1088_v43, 4 }
 0x26f   : > { %v1262_v7 = vpop.f32.mrf.mxu0  ;;  %v1303_v62 = vpop.f32.mrf.mxu1 }
 0x270   : > { %v1525_v8 = vadd.f32 %v1523_v5, %v1261_v6  ;;  %v1263_v15 = vadd.f32 %v1262_v7, %v4301_v14  ;;  %v1093_v7 = vld [vmem:[%s3934_s26 + $0xc] sm:$0xff] }
 0x271   : > { %v1264_v57 = vpop.f32.mrf.mxu0  ;;  %v2859_v3 = vpop.f32.mrf.mxu1  ;;  %v1575_v9 = vunpack.c.l.bf16 %v1093_v7  ;;  %v1593_v21 = vrot.slane %v1093_v7, 4 }
 0x272   : > { %v2651_v52 = vmul.f32 -1.442695, %v1525_v8  ;;  %v1265_v56 = vadd.f32 %v1264_v57, %v4300_v60  ;;  %v1547_v6 = vadd.f32 %v1545_v16, %v1263_v15  ;;  %v1546_v8 = vunpack.c.l.bf16 %v1542_v35  ;;  %v1095_v16 = vld [vmem:[%s3934_s26 + $0x24] sm:$0xff] }
 0x273   : > { %v1306_v11 = vpop.f32.mrf.mxu1  ;;  %v1266_v5 = vpop.f32.mrf.mxu0 }
 0x274   : > { %2997 = vpow2.f32 %v2651_v52  ;;  %v1526_v10 = vadd.f32 %v1524_v0, %v1265_v56  ;;  %v1267_v17 = vadd.f32 %v1266_v5, %v4301_v14  ;;  %v2653_v57 = vmul.f32 -1.442695, %v1547_v6  ;;  %v4303_v56 = vld [vmem:[#allocation75_spill] sm:$0xff] }
 0x275   : > { %v2860_v13 = vpop.f32.mrf.mxu1 }
 0x276   : > { %v2652_v12 = vmul.f32 -1.442695, %v1526_v10  ;;  %v1548_v3 = vadd.f32 %v1546_v8, %v1267_v17  ;;  %v4302_v17 = vld [vmem:[#allocation80_spill] sm:$0xff] }
 0x277   : > { %v1304_v43 = vadd.f32 %v1303_v62, %v4302_v17 }
 0x278   : > { %2999 = vpow2.f32 %v2652_v12  ;;  %v2654_v0 = vmul.f32 -1.442695, %v1548_v3  ;;  %v1087_v12 = vld [vmem:[%s3925_s24 + $0x8] ss:$24 sps:$4 sm:$0xff]   ;;  %v1576_v3 = vunpack.c.l.bf16 %v1095_v16 }
 0x279   : > { %3001 = vpow2.f32 %v2653_v57  ;;  %v1563_v8 = vunpack.c.l.bf16 %v1087_v12  ;;  %v1564_v20 = vunpack.c.h.bf16 %v1087_v12 }
 0x281   : > { %v2998_v4 = vpop.eup %2997 }
 0x282   : > { %v1533_v52 = vadd.f32 1.0, %v2998_v4 }
 0x284   : > { %3003 = vrcp.f32 %v1533_v52 }
 0x285   : > { %v3000_v10 = vpop.eup %2999  ;;  %3005 = vpow2.f32 %v2654_v0 }
 0x286   : > { %v1534_v13 = vadd.f32 1.0, %v3000_v10  ;;  %v3002_v6 = vpop.eup %3001 }
 0x287   : > { %v1555_v19 = vadd.f32 1.0, %v3002_v6  ;;  %v1594_v6 = vrot.slane %v1095_v16, 4 }
 0x288   : > { %3007 = vrcp.f32 %v1534_v13 }
 0x28d   : > { %v1473_v15 = vpop.f32.mrf.mxu0 }
 0x28e   : > { %v1474_v35 = vadd.f32 %v1473_v15, %v4303_v56  ;;  %v1307_v15 = vadd.f32 %v1306_v11, %v4302_v17 }
 0x28f   : > { %v1475_v5 = vpop.f32.mrf.mxu0  ;;  %v3941_v4 = vpop.f32.mrf.mxu1 }
 0x290   : > { %v1577_v57 = vadd.f32 %v1575_v9, %v1474_v35 }
 0x291   : > { %v3004_v52 = vpop.eup %3003  ;;  %v1477_v0 = vpop.f32.mrf.mxu0 }
 0x292   : > { %v1561_v10 = vmul.f32 %v3004_v52, %v1304_v43  ;;  %v2655_v13 = vmul.f32 -1.442695, %v1577_v57  ;;  %v1478_v14 = vadd.f32 %v1477_v0, %v4303_v56  ;;  %v2879_v18 = vpop.f32.mrf.mxu1  ;;  %v3006_v62 = vpop.eup %3005  ;;  %v4304_v57 = vld [vmem:[#allocation78_spill] sm:$0xff] }
 0x293   : > { %v1476_v52 = vadd.f32 %v1475_v5, %v4304_v57  ;;  %v1597_v18 = vunpack.c.l.bf16 %v1593_v21  ;;  %v1556_v12 = vadd.f32 1.0, %v3006_v62 }
 0x294   : > { %v1565_v22 = vadd.f32 %v1563_v8, %v1561_v10  ;;  %3009 = vpow2.f32 %v2655_v13  ;;  %v1578_v23 = vadd.f32 %v1576_v3, %v1478_v14  ;;  %v3945_v9 = vpop.f32.mrf.mxu1  ;;  %v1479_v8 = vpop.f32.mrf.mxu0  ;;  %v1598_v14 = vunpack.c.l.bf16 %v1594_v6 }
 0x295   : > { %v3008_v35 = vpop.eup %3007  ;;  %v1599_v0 = vadd.f32 %v1597_v18, %v1476_v52  ;;  %v1480_v11 = vadd.f32 %v1479_v8, %v4304_v57  ;;  %v1094_v8 = vld [vmem:[%s3934_s26 + $0x14] ss:$24 sps:$4 sm:$0xff]  }
 0x296   : > { %3011 = vtanh.f32 %v1565_v22  ;;  %v1562_v24 = vmul.f32 %v3008_v35, %v1307_v15  ;;  %v2656_v25 = vmul.f32 -1.442695, %v1578_v23  ;;  %v2880_v43 = vpop.f32.mrf.mxu1 }
 0x297   : > { %3013 = vrcp.f32 %v1555_v19  ;;  %v2657_v3 = vmul.f32 -1.442695, %v1599_v0  ;;  %v1600_v22 = vadd.f32 %v1598_v14, %v1480_v11  ;;  %v1637_v19 = vpop.permute.xlu0 %1636  ;;  %v4305_v0 = vld [vmem:[#allocation81_spill] sm:$0xff] }
 0x298   : > { %v1566_v7 = vadd.f32 %v1564_v20, %v1562_v24  ;;  %3015 = vpow2.f32 %v2656_v25  ;;  %vm1641_vm6 = vcmp.eq.s32.totalorder %v1637_v19, 1  ;;  %v1517_v11 = vadd.f32 %v3941_v4, %v4305_v0 }
 0x299   : > { %v2658_v21 = vmul.f32 -1.442695, %v1600_v22 }
 0x29a   : > { %3017 = vtanh.f32 %v1566_v7 }
 0x29b   : > { %3019 = vrcp.f32 %v1556_v12  ;;  %v1640_v35 = vpop.permute.xlu0 %1639 }
 0x29c   : > { %3021 = vpow2.f32 %v2657_v3  ;;  %vm1642_vm7 = vcmp.eq.s32.totalorder %v1640_v35, 1  ;;  %v1662_v35 = vpop.permute.xlu1 %1661 }
 0x29d   : > { %vm1666_vm8 = vcmp.eq.s32.totalorder %v1662_v35, 1 }
 0x2a1   : > { %v3010_v23 = vpop.eup %3009 }
 0x2a2   : > { %v1585_v10 = vadd.f32 1.0, %v3010_v23  ;;  %v1615_v23 = vunpack.c.l.bf16 %v1094_v8 }
 0x2a3   : > { %v3012_v13 = vpop.eup %3011 }
 0x2a4   : > { %v3014_v16 = vpop.eup %3013  ;;  %3023 = vrcp.f32 %v1585_v10  ;;  %v1569_v20 = vsub.f32 %v3293_v46, %v3012_v13 }
 0x2a5   : > { %v3016_v24 = vpop.eup %3015  ;;  %3025 = vpow2.f32 %v2658_v21 }
 0x2a6   : > { %v1586_v25 = vadd.f32 1.0, %v3016_v24  ;;  %v1571_v5 = vmul.f32 %v3014_v16, %v1569_v20  ;;  %v1520_v20 = vadd.f32 %v3945_v9, %v4305_v0  ;;  %v1616_v24 = vunpack.c.h.bf16 %v1094_v8 }
 0x2a7   : > { %v3018_v62 = vpop.eup %3017 }
 0x2a8   : > { %3027 = vrcp.f32 %v1586_v25  ;;  %v1573_v15 = vadd.f32 %v3012_v13, %v1571_v5  ;;  %v1570_v43 = vsub.f32 %v3289_v42, %v3018_v62  ;;  %v3020_v52 = vpop.eup %3019 }
 0x2a9   : > { %v3022_v22 = vpop.eup %3021 }
 0x2aa   : > { %v1643_v18 = vsel %vm1641_vm6, %v1573_v15, 0.0  ;;  %v1683_v46 = vsel %vm1641_vm6, %v1573_v15, %v3293_v46   ;;  %v1572_v6 = vmul.f32 %v3020_v52, %v1570_v43  ;;  %v1607_v21 = vadd.f32 1.0, %v3022_v22 }
 0x2ab   : > { %v2752_v12 = vpack.c.bf16 %v1643_v18, %v1643_v18 }
 0x2ac   : > { %v1574_v7 = vadd.f32 %v3018_v62, %v1572_v6 }
 0x2ad   : > { %1656 = vst [vmem:[%s1655_s27] sm:$0xf] %v2752_v12 }
 0x2ae   : > { %v1644_v14 = vsel %vm1642_vm7, %v1574_v7, 0.0  ;;  %v1684_v42 = vsel %vm1642_vm7, %v1574_v7, %v3289_v42  }
 0x2af   : > { %v2753_v3 = vpack.c.bf16 %v1644_v14, %v1644_v14 }
 0x2b1   : > { %v3024_v10 = vpop.eup %3023  ;;  %1657 = vst [vmem:[%s1655_s27 + $0x8] sm:$0xf] %v2753_v3 }
 0x2b2   : > { %v1613_v19 = vmul.f32 %v3024_v10, %v1517_v11  ;;  %v3026_v13 = vpop.eup %3025  ;;  %v1665_v11 = vpop.permute.xlu1 %1664 }
 0x2b3   : > { %v1608_v5 = vadd.f32 1.0, %v3026_v13  ;;  %vm1667_vm9 = vcmp.eq.s32.totalorder %v1665_v11, 1 }
 0x2b4   : > { %v1617_v16 = vadd.f32 %v1615_v23, %v1613_v19 }
 0x2b5   : > { %v3028_v25 = vpop.eup %3027 }
 0x2b6   : > { %3029 = vtanh.f32 %v1617_v16  ;;  %v1614_v4 = vmul.f32 %v3028_v25, %v1520_v20 }
 0x2b7   : > { %3031 = vrcp.f32 %v1607_v21 }
 0x2b8   : > { %v1618_v62 = vadd.f32 %v1616_v24, %v1614_v4 }
 0x2ba   : > { %3033 = vtanh.f32 %v1618_v62 }
 0x2bb   : > { %3035 = vrcp.f32 %v1608_v5 }
 0x2c3   : > { %v3030_v15 = vpop.eup %3029 }
 0x2c4   : > { %v1621_v43 = vsub.f32 %v3285_v44, %v3030_v15  ;;  %v3032_v52 = vpop.eup %3031 }
 0x2c6   : > { %v1623_v18 = vmul.f32 %v3032_v52, %v1621_v43 }
 0x2c7   : > { %v3034_v6 = vpop.eup %3033 }
 0x2c8   : > { %v1625_v9 = vadd.f32 %v3030_v15, %v1623_v18  ;;  %v1622_v12 = vsub.f32 %v3281_v48, %v3034_v6  ;;  %v3036_v7 = vpop.eup %3035 }
 0x2ca   : > { %v1668_v8 = vsel %vm1666_vm8, %v1625_v9, 0.0  ;;  %v1685_v44 = vsel %vm1666_vm8, %v1625_v9, %v3285_v44   ;;  %v1624_v14 = vmul.f32 %v3036_v7, %v1622_v12 }
 0x2cb   : > { %v2755_v3 = vpack.c.bf16 %v1668_v8, %v1668_v8 }
 0x2cc   : > { %v1626_v22 = vadd.f32 %v3034_v6, %v1624_v14 }
 0x2cd   : > { %1681 = vst [vmem:[%s1680_s29 + $0x4] sm:$0xf] %v2755_v3  ;;  %1076 = sbr.rel (!%p1073_p12) target bundleno = 395 (0x18b), region = 107 }
 0x2ce   : > { %v1669_v23 = vsel %vm1667_vm9, %v1626_v22, 0.0  ;;  %v1686_v48 = vsel %vm1667_vm9, %v1626_v22, %v3281_v48  }
 0x2cf   : > { %v2756_v10 = vpack.c.bf16 %v1669_v23, %v1669_v23 }
 0x2d1   : > { %1682 = vst [vmem:[%s1680_s29 + $0xc] sm:$0xf] %v2756_v10 }
 0x2d2 PF:  { %p2503_p13 = scmp.ge.s32.totalorder %s4136_s0, 8 }
 0x2d3   :  { %s3299_s2 = smov (!%p2503_p13), %s4136_s0  }
 0x2d4   :  { %2504 = sbr.rel (%p2503_p13) target bundleno = 737 (0x2e1), region = 112 }
 0x2d9 LB: > { %s2758_s9 = sshll.u32 %s3301_s2, 4  ;;  %v3318_v19 = vmov 0   ;;  %s1690_s2 = sadd.s32 1, %s3301_s2   ;;  %s3301_s2 = sphi %s3299_s2, %s1690_s2  }
 0x2da   : > { %s1695_s16 = scalar_lea.vmem [#allocation3], %s2758_s9  ;;  %p1689_p0 = scmp.ge.s32.totalorder %s1690_s2, 8 }
 0x2db   : > { %1696 = vst [vmem:[%s1695_s16] sm:$0xff] %v3318_v19  ;;  %1697 = vst [vmem:[%s1695_s16 + $0x8] sm:$0xff] %v3318_v19 }
 0x2dc   :  { %1692 = sbr.rel (!%p1689_p0) target bundleno = 729 (0x2d9), region = 118 }
 0x2e1 PF:  { %v3037_v26 = vld [vmem:[#allocation14 + $0x78] sm:$0xff]   ;;  %v3039_v28 = vld [vmem:[#allocation14 + $0x70] sm:$0xff]   ;;  %v3041_v30 = vld [vmem:[#allocation14 + $0x68] sm:$0xff]   ;;  %vm2156_vm10 = vcmask 130112   ;;  %vm2221_vm11 = vcmask 1041409   ;;  %vm2223_vm12 = vcmask 1042434  }
 0x2e2   :  { %v3038_v27 = vld [vmem:[#allocation14 + $0x38] sm:$0xff]   ;;  %2777 = vmatprep.subr.bf16.mxu0 %v3037_v26  ;;  %2885 = vmatprep.subr.bf16.mxu1 %v3037_v26  ;;  %v3040_v29 = vld [vmem:[#allocation14 + $0x30] sm:$0xff]   ;;  %v3042_v31 = vld [vmem:[#allocation14 + $0x28] sm:$0xff]   ;;  %vm2225_vm13 = vcmask 1043459   ;;  %vm2227_vm14 = vcmask 1044484   ;;  %vm2229_vm15 = vcmask 1045509  }
 0x2e3   :  { %2778 = vmatpush3.bf16.msra.mxu0 %v3038_v27  ;;  %2893 = vmatpush3.bf16.msra.mxu1 %v3038_v27  ;;  %v3043_v32 = vld [vmem:[#allocation14 + $0x60] sm:$0xff]   ;;  %v3045_v34 = vld [vmem:[#allocation14 + $0x58] sm:$0xff]   ;;  %v3047_v38 = vld [vmem:[#allocation14 + $0x50] sm:$0xff]   ;;  %vm2231_vm0 = vcmask 1046534   ;;  %vm2233_vm1 = vcmask 1047559   ;;  %vm2237_vm2 = vcmask 130048  }
 0x2e4   :  { %2779 = vmatprep.subr.bf16.mxu0 %v3039_v28  ;;  %2886 = vmatprep.subr.bf16.mxu1 %v3039_v28  ;;  %v3044_v33 = vld [vmem:[#allocation14 + $0x20] sm:$0xff]   ;;  %v3046_v36 = vld [vmem:[#allocation14 + $0x18] sm:$0xff]   ;;  %v3986_v61 = vld [vmem:[#allocation3 + $0x8] sm:$0xff] }
 0x2e5   :  { %v3984_v59 = vld [vmem:[#allocation3] sm:$0xff]  ;;  %v3992_v44 = vld [vmem:[#allocation3 + $0x48] sm:$0xff]  ;;  %v3048_v46 = vld [vmem:[#allocation14 + $0x10] sm:$0xff]  }
 0x2e6   :  { %v3988_v63 = vld [vmem:[#allocation3 + $0x40] sm:$0xff]  ;;  %v2670_v48 = vcombine.high %v3984_v59, %v3986_v61  ;;  %v3049_v37 = vld [vmem:[#allocation14 + $0x48] sm:$0xff]   ;;  %v3996_v50 = vld [vmem:[#allocation3 + $0x10] sm:$0xff]  ;;  %v2669_v58 = vcombine.low %v3984_v59, %v3986_v61 }
 0x2e7   :  { %2780 = vmatpush3.bf16.msra.mxu0 %v3040_v29  ;;  %2894 = vmatpush3.bf16.msra.mxu1 %v3040_v29  ;;  %v2678_v42 = vcombine.high %v3988_v63, %v3992_v44  ;;  %v3050_v51 = vld [vmem:[#allocation14 + $0x8] sm:$0xff]   ;;  %v3051_v55 = vld [vmem:[#allocation14 + $0x40] sm:$0xff]   ;;  %v3998_v54 = vld [vmem:[#allocation3 + $0x18] sm:$0xff]  ;;  %v2677_v47 = vcombine.low %v3988_v63, %v3992_v44 }
 0x2e8   :  { %2781 = vmatprep.subr.bf16.mxu0 %v3041_v30  ;;  %2887 = vmatprep.subr.bf16.mxu1 %v3041_v30  ;;  %v3052_v49 = vld [vmem:[#allocation14] sm:$0xff]   ;;  %v4000_v53 = vld [vmem:[#allocation3 + $0x50] sm:$0xff]  ;;  %v4002_v41 = vld [vmem:[#allocation3 + $0x58] sm:$0xff]  ;;  %v2672_v39 = vcombine.high %v3996_v50, %v3998_v54  ;;  %v2671_v0 = vcombine.low %v3996_v50, %v3998_v54 }
 0x2e9   :  { %1954 = vmatprep.mubr.bf16.mxu0 %v2670_v48  ;;  %1986 = vmatprep.mubr.bf16.mxu1 %v2678_v42  ;;  %v2680_v40 = vcombine.high %v4000_v53, %v4002_v41  ;;  %v4012_v60 = vld [vmem:[#allocation3 + $0x20] sm:$0xff]  ;;  %v4014_v17 = vld [vmem:[#allocation3 + $0x28] sm:$0xff]  ;;  %v2679_v13 = vcombine.low %v4000_v53, %v4002_v41  ;;  %v4028_v20 = vld [vmem:[#allocation3 + $0x30] sm:$0xff] }
 0x2ea   :  { %v4016_v56 = vld [vmem:[#allocation3 + $0x60] sm:$0xff]  ;;  %v4018_v57 = vld [vmem:[#allocation3 + $0x68] sm:$0xff]  ;;  %v2674_v21 = vcombine.high %v4012_v60, %v4014_v17  ;;  %v4030_v24 = vld [vmem:[#allocation3 + $0x38] sm:$0xff]  ;;  %v2673_v5 = vcombine.low %v4012_v60, %v4014_v17 }
 0x2eb   :  { %2782 = vmatpush3.bf16.msra.mxu0 %v3042_v31  ;;  %2895 = vmatpush3.bf16.msra.mxu1 %v3042_v31  ;;  %v2682_v16 = vcombine.high %v4016_v56, %v4018_v57  ;;  %v4032_v25 = vld [vmem:[#allocation3 + $0x70] sm:$0xff]  ;;  %v4034_v4 = vld [vmem:[#allocation3 + $0x78] sm:$0xff]  ;;  %v2681_v62 = vcombine.low %v4016_v56, %v4018_v57  ;;  %v2676_v15 = vcombine.high %v4028_v20, %v4030_v24 }
 0x2ec   :  { %2783 = vmatprep.subr.bf16.mxu0 %v3043_v32  ;;  %2888 = vmatprep.subr.bf16.mxu1 %v3043_v32  ;;  %v2684_v35 = vcombine.high %v4032_v25, %v4034_v4  ;;  %v2675_v43 = vcombine.low %v4028_v20, %v4030_v24  ;;  %v2683_v52 = vcombine.low %v4032_v25, %v4034_v4 }
 0x2ef   :  { %2784 = vmatpush3.bf16.msra.mxu0 %v3044_v33  ;;  %2896 = vmatpush3.bf16.msra.mxu1 %v3044_v33 }
 0x2f0   :  { %2785 = vmatprep.subr.bf16.mxu0 %v3045_v34  ;;  %2889 = vmatprep.subr.bf16.mxu1 %v3045_v34 }
 0x2f3   :  { %2786 = vmatpush3.bf16.msra.mxu0 %v3046_v36  ;;  %2897 = vmatpush3.bf16.msra.mxu1 %v3046_v36 }
 0x2f4   :  { %2787 = vmatprep.subr.bf16.mxu0 %v3047_v38  ;;  %2890 = vmatprep.subr.bf16.mxu1 %v3047_v38 }
 0x2f7   :  { %2788 = vmatpush3.bf16.msra.mxu0 %v3048_v46  ;;  %2898 = vmatpush3.bf16.msra.mxu1 %v3048_v46  ;;  %v4051_v46 = vld [vmem:[%s4146_s10] ss:$0 sm:$0xff]  ;;  %s3319_s10 = smov [#allocation16]  }
 0x2f8   :  { %2789 = vmatprep.subr.bf16.mxu0 %v3049_v37  ;;  %2891 = vmatprep.subr.bf16.mxu1 %v3049_v37  ;;  %s2460_s7 = sshll.u32 %s3319_s10, 4  ;;  %s2461_s7 = int_to_ptr.vmem [resolvable:$true] %s2460_s7 }
 0x2f9   :  { %s3205_s8 = scalar_lea.vmem %s2461_s7, 128  ;;  %p3210_p2 = scmp.lt.s32.totalorder %s2461_s7, %s2461_s7 }
 0x2fa   :  { %p3206_p1 = scmp.ne.s32.totalorder %s2461_s7, %s3205_s8  ;;  %p3211_p3 = scmp.lt.s32.totalorder %s3205_s8, %s3205_s8 }
 0x2fb   :  { %2790 = vmatpush3.bf16.msra.mxu0 %v3050_v51  ;;  %2899 = vmatpush3.bf16.msra.mxu1 %v3050_v51 }
 0x2fc   :  { %2791 = vmatprep.subr.bf16.mxu0 %v3051_v55  ;;  %2892 = vmatprep.subr.bf16.mxu1 %v3051_v55  ;;  %p3212_p4 = por %p3211_p3, %p3210_p2 }
 0x2fe   :  { %p3213_p5 = pnand %p3212_p4, %p3206_p1 }
 0x2ff   :  { %2792 = vmatpush3.bf16.msra.mxu0 %v3052_v49  ;;  %2900 = vmatpush3.bf16.msra.mxu1 %v3052_v49 }
 0x302   :  { %1955 = vmatmul.mubr.bf16.vlgmr.msra.gmra.mxu0 %v2669_v58  ;;  %1987 = vmatmul.mubr.bf16.vlgmr.msra.gmra.mxu1 %v2677_v47 }
 0x303   :  { %1962 = vmatprep.mubr.bf16.mxu0 %v2672_v39  ;;  %1994 = vmatprep.mubr.bf16.mxu1 %v2680_v40 }
 0x30a   :  { %1963 = vmatmul.mubr.bf16.gmra.mxu0 %v2671_v0  ;;  %1995 = vmatmul.mubr.bf16.gmra.mxu1 %v2679_v13 }
 0x30b   :  { %1970 = vmatprep.mubr.bf16.mxu0 %v2674_v21  ;;  %2002 = vmatprep.mubr.bf16.mxu1 %v2682_v16 }
 0x312   :  { %1971 = vmatmul.mubr.bf16.gmra.mxu0 %v2673_v5  ;;  %2003 = vmatmul.mubr.bf16.gmra.mxu1 %v2681_v62 }
 0x313   :  { %1978 = vmatprep.mubr.bf16.mxu0 %v2676_v15  ;;  %2010 = vmatprep.mubr.bf16.mxu1 %v2684_v35 }
 0x31a   :  { %1979 = vmatmul.mubr.bf16.gmra.mxu0 %v2675_v43  ;;  %2011 = vmatmul.mubr.bf16.gmra.mxu1 %v2683_v52 }
 0x3c2   :  { %v2793_v18 = vpop.f32.mrf.mxu0  ;;  %v2817_v6 = vpop.f32.mrf.mxu1 }
 0x3c4   :  { %v2794_v9 = vpop.f32.mrf.mxu0  ;;  %v2818_v12 = vpop.f32.mrf.mxu1 }
 0x3c5   :  { %v2795_v7 = vadd.f32 %v2794_v9, %v2793_v18  ;;  %v2819_v8 = vadd.f32 %v2818_v12, %v2817_v6 }
 0x3c6   :  { %v2796_v11 = vpop.f32.mrf.mxu0  ;;  %v2820_v14 = vpop.f32.mrf.mxu1 }
 0x3c7   :  { %3069 = vtanh.f32 %v2795_v7 }
 0x3c8   :  { %v2797_v3 = vpop.f32.mrf.mxu0  ;;  %v2821_v22 = vpop.f32.mrf.mxu1  ;;  %3071 = vtanh.f32 %v2819_v8 }
 0x3c9   :  { %v2798_v23 = vadd.f32 %v2797_v3, %v2796_v11  ;;  %v2822_v10 = vadd.f32 %v2821_v22, %v2820_v14 }
 0x3ca   :  { %v2799_v19 = vpop.f32.mrf.mxu0  ;;  %v2823_v26 = vpop.f32.mrf.mxu1 }
 0x3cb   :  { %3073 = vtanh.f32 %v2822_v10 }
 0x3cc   :  { %v2800_v27 = vpop.f32.mrf.mxu0  ;;  %v2824_v28 = vpop.f32.mrf.mxu1  ;;  %3075 = vtanh.f32 %v2798_v23 }
 0x3cd   :  { %v2801_v29 = vadd.f32 %v2800_v27, %v2799_v19  ;;  %v2825_v30 = vadd.f32 %v2824_v28, %v2823_v26 }
 0x3ce   :  { %v2802_v31 = vpop.f32.mrf.mxu0  ;;  %v2826_v32 = vpop.f32.mrf.mxu1 }
 0x3cf   :  { %3077 = vtanh.f32 %v2801_v29 }
 0x3d0   :  { %v2803_v33 = vpop.f32.mrf.mxu0  ;;  %v2827_v34 = vpop.f32.mrf.mxu1  ;;  %3079 = vtanh.f32 %v2825_v30 }
 0x3d1   :  { %v2804_v36 = vadd.f32 %v2803_v33, %v2802_v31  ;;  %v2828_v38 = vadd.f32 %v2827_v34, %v2826_v32 }
 0x3d2   :  { %v2805_v48 = vpop.f32.mrf.mxu0  ;;  %v2829_v42 = vpop.f32.mrf.mxu1 }
 0x3d3   :  { %3081 = vtanh.f32 %v2804_v36 }
 0x3d4   :  { %v3070_v37 = vpop.eup %3069  ;;  %v2806_v51 = vpop.f32.mrf.mxu0  ;;  %3083 = vtanh.f32 %v2828_v38 }
 0x3d5   :  { %v2830_v55 = vpop.f32.mrf.mxu1  ;;  %v2807_v49 = vadd.f32 %v2806_v51, %v2805_v48  ;;  %v2042_v47 = vmul.f32 %v3070_v37, %v4051_v46  ;;  %v3072_v39 = vpop.eup %3071 }
 0x3d6   :  { %v2831_v58 = vadd.f32 %v2830_v55, %v2829_v42  ;;  %v2808_v40 = vpop.f32.mrf.mxu0  ;;  %v2050_v62 = vmul.f32 %v3072_v39, %v4051_v46 }
 0x3d7   :  { %v2832_v0 = vpop.f32.mrf.mxu1  ;;  %3085 = vtanh.f32 %v2807_v49  ;;  %2058 = vadd.xlane.f32.xlu0 %v2042_v47 }
 0x3d8   :  { %v2809_v13 = vpop.f32.mrf.mxu0  ;;  %v3074_v16 = vpop.eup %3073  ;;  %3087 = vtanh.f32 %v2831_v58 }
 0x3d9   :  { %v2833_v21 = vpop.f32.mrf.mxu1  ;;  %v2810_v5 = vadd.f32 %v2809_v13, %v2808_v40  ;;  %v3076_v15 = vpop.eup %3075  ;;  %v2051_v18 = vmul.f32 %v3074_v16, %v4051_v46 }
 0x3da   :  { %v2834_v35 = vadd.f32 %v2833_v21, %v2832_v0  ;;  %v2811_v43 = vpop.f32.mrf.mxu0  ;;  %v2043_v14 = vmul.f32 %v3076_v15, %v4051_v46 }
 0x3db   :  { %v2835_v52 = vpop.f32.mrf.mxu1  ;;  %3089 = vtanh.f32 %v2810_v5  ;;  %2074 = vadd.xlane.f32.xlu0 %v2050_v62  ;;  %2076 = vadd.xlane.f32.xlu1 %v2051_v18 }
 0x3dc   :  { %v3078_v6 = vpop.eup %3077  ;;  %v2812_v9 = vpop.f32.mrf.mxu0  ;;  %3091 = vtanh.f32 %v2834_v35 }
 0x3dd   :  { %v2836_v12 = vpop.f32.mrf.mxu1  ;;  %v2813_v7 = vadd.f32 %v2812_v9, %v2811_v43  ;;  %v2044_v11 = vmul.f32 %v3078_v6, %v4051_v46  ;;  %v3080_v3 = vpop.eup %3079  ;;  %v4306_v9 = vlaneseq }
 0x3de   :  { %v2837_v8 = vadd.f32 %v2836_v12, %v2835_v52  ;;  %v2814_v22 = vpop.f32.mrf.mxu0  ;;  %v2052_v29 = vmul.f32 %v3080_v3, %v4051_v46 }
 0x3df   :  { %v2838_v23 = vpop.f32.mrf.mxu1  ;;  %3093 = vtanh.f32 %v2813_v7  ;;  %2060 = vadd.xlane.f32.xlu0 %v2043_v14  ;;  %2062 = vadd.xlane.f32.xlu1 %v2044_v11  ;;  %v2146_v12 = vand.u32 127, %v4306_v9 }
 0x3e0   :  { %v3082_v10 = vpop.eup %3081  ;;  %v2815_v19 = vpop.f32.mrf.mxu0  ;;  %3095 = vtanh.f32 %v2837_v8 }
 0x3e1   :  { %v2839_v26 = vpop.f32.mrf.mxu1  ;;  %v2816_v27 = vadd.f32 %v2815_v19, %v2814_v22  ;;  %v2045_v28 = vmul.f32 %v3082_v10, %v4051_v46  ;;  %v3084_v31 = vpop.eup %3083  ;;  %v2151_v8 = vadd.s32 4294967288, %v2146_v12 }
 0x3e2   :  { %v2840_v30 = vadd.f32 %v2839_v26, %v2838_v23  ;;  %v2053_v36 = vmul.f32 %v3084_v31, %v4051_v46 }
 0x3e3   :  { %3097 = vtanh.f32 %v2816_v27  ;;  %2078 = vadd.xlane.f32.xlu0 %v2052_v29  ;;  %2064 = vadd.xlane.f32.xlu1 %v2045_v28  ;;  %v2154_v11 = vsub.s32 %v2151_v8, %v3576_v45 }
 0x3e4   :  { %v3086_v32 = vpop.eup %3085  ;;  %3099 = vtanh.f32 %v2840_v30 }
 0x3e5   :  { %v2046_v33 = vmul.f32 %v3086_v32, %v4051_v46  ;;  %v3088_v34 = vpop.eup %3087 }
 0x3e6   :  { %v2054_v42 = vmul.f32 %v3088_v34, %v4051_v46 }
 0x3e7   :  { %2066 = vadd.xlane.f32.xlu0 %v2046_v33  ;;  %2080 = vadd.xlane.f32.xlu1 %v2053_v36 }
 0x3e8   :  { %v3090_v38 = vpop.eup %3089 }
 0x3e9   :  { %v2047_v48 = vmul.f32 %v3090_v38, %v4051_v46  ;;  %v3092_v37 = vpop.eup %3091 }
 0x3ea   :  { %v2055_v58 = vmul.f32 %v3092_v37, %v4051_v46 }
 0x3eb   :  { %2082 = vadd.xlane.f32.xlu0 %v2054_v42  ;;  %2068 = vadd.xlane.f32.xlu1 %v2047_v48 }
 0x3ec   :  { %v3094_v51 = vpop.eup %3093 }
 0x3ed   :  { %v2048_v55 = vmul.f32 %v3094_v51, %v4051_v46  ;;  %v3096_v49 = vpop.eup %3095 }
 0x3ee   :  { %v2056_v40 = vmul.f32 %v3096_v49, %v4051_v46 }
 0x3ef   :  { %2070 = vadd.xlane.f32.xlu0 %v2048_v55  ;;  %2084 = vadd.xlane.f32.xlu1 %v2055_v58 }
 0x3f0   :  { %v3098_v47 = vpop.eup %3097 }
 0x3f1   :  { %v2049_v39 = vmul.f32 %v3098_v47, %v4051_v46  ;;  %v3100_v0 = vpop.eup %3099 }
 0x3f2   :  { %v2057_v13 = vmul.f32 %v3100_v0, %v4051_v46 }
 0x3f3   :  { %2086 = vadd.xlane.f32.xlu0 %v2056_v40  ;;  %2072 = vadd.xlane.f32.xlu1 %v2049_v39 }
 0x3f7   :  { %2088 = vadd.xlane.f32.xlu1 %v2057_v13 }
 0x420   :  { %2092 = vxpose.xlu0.b32.start [1/2] (short) (narrow) %v3408_v1, 8 }
 0x424   :  { %2093 = vxpose.xlu0.b32.end [2/2] (short) (narrow) %v3413_v2, 8  ;;  %v2149_v2 = vsub.s32 %v2146_v12, %v3576_v45 }
 0x460   :  { %v2059_v16 = vpop.xlane.xlu0 %2058 }
 0x461   :  { %v2150_v27 = vrot.slane %v2059_v16, %v2149_v2 }
 0x464   :  { %v2077_v21 = vpop.xlane.xlu1 %2076  ;;  %v2075_v62 = vpop.xlane.xlu0 %2074 }
 0x465   :  { %v2192_v33 = vrot.slane %v2077_v21, %v2154_v11  ;;  %v2188_v34 = vrot.slane %v2075_v62, %v2149_v2 }
 0x467   :  { %v2193_v37 = vsel %vm2156_vm10, %v2192_v33, %v2188_v34  ;;  %v4309_v33 = vld [vmem:[#allocation76_spill] sm:$0xff] }
 0x468   :  { %v2063_v5 = vpop.xlane.xlu1 %2062  ;;  %v2061_v35 = vpop.xlane.xlu0 %2060 }
 0x469   :  { %v2161_v23 = vrot.slane %v2063_v5, %v2149_v2  ;;  %v2155_v10 = vrot.slane %v2061_v35, %v2154_v11  ;;  %v4307_v35 = vld [vmem:[#allocation73_spill] sm:$0xff] }
 0x46b   :  { %v2157_v31 = vsel %vm2156_vm10, %v2155_v10, %v2150_v27 }
 0x46c   :  { %v2065_v15 = vpop.xlane.xlu1 %2064  ;;  %v2079_v52 = vpop.xlane.xlu0 %2078 }
 0x46d   :  { %v2165_v14 = vrot.slane %v2065_v15, %v2154_v11  ;;  %v2197_v55 = vrot.slane %v2079_v52, %v2149_v2 }
 0x46f   :  { %v2166_v28 = vsel %vm2156_vm10, %v2165_v14, %v2161_v23 }
 0x470   :  { %v2081_v43 = vpop.xlane.xlu1 %2080  ;;  %v2067_v6 = vpop.xlane.xlu0 %2066  ;;  %v2222_v36 = vsel %vm2221_vm11, %v2166_v28, %v2157_v31 }
 0x471   :  { %v2170_v26 = vrot.slane %v2067_v6, %v2149_v2  ;;  %v2201_v42 = vrot.slane %v2081_v43, %v2154_v11 }
 0x473   :  { %v2202_v39 = vsel %vm2156_vm10, %v2201_v42, %v2197_v55  ;;  %v2325_v55 = vsub.s32 6, %v3576_v45 }
 0x474   :  { %v2069_v18 = vpop.xlane.xlu1 %2068  ;;  %v2083_v46 = vpop.xlane.xlu0 %2082 }
 0x475   :  { %v2174_v3 = vrot.slane %v2069_v18, %v2154_v11  ;;  %v2206_v0 = vrot.slane %v2083_v46, %v2149_v2 }
 0x477   :  { %v2175_v30 = vsel %vm2156_vm10, %v2174_v3, %v2170_v26 }
 0x478   :  { %v2085_v7 = vpop.xlane.xlu1 %2084  ;;  %v2071_v22 = vpop.xlane.xlu0 %2070  ;;  %v2224_v38 = vsel %vm2223_vm12, %v2175_v30, %v2222_v36  ;;  %v4308_v30 = vsub.s32 4, %v3576_v45  ;;  %v4310_v36 = vld [vmem:[#allocation79_spill] sm:$0xff] }
 0x479   :  { %v2179_v29 = vrot.slane %v2071_v22, %v2149_v2  ;;  %v2210_v58 = vrot.slane %v2085_v7, %v2154_v11 }
 0x47b   :  { %v2211_v16 = vsel %vm2156_vm10, %v2210_v58, %v2206_v0  ;;  %v2336_v58 = vsub.s32 7, %v3576_v45 }
 0x47c   :  { %v2073_v1 = vpop.xlane.xlu1 %2072  ;;  %v2087_v47 = vpop.xlane.xlu0 %2086 }
 0x47d   :  { %v2183_v19 = vrot.slane %v2073_v1, %v2154_v11  ;;  %v2215_v21 = vrot.slane %v2087_v47, %v2149_v2 }
 0x47f   :  { %v2184_v32 = vsel %vm2156_vm10, %v2183_v19, %v2179_v29 }
 0x480   :  { %v2226_v48 = vsel %vm2225_vm13, %v2184_v32, %v2224_v38  ;;  %v2089_v51 = vpop.xlane.xlu1 %2088 }
 0x481   :  { %v2228_v49 = vsel %vm2227_vm14, %v2193_v37, %v2226_v48  ;;  %v2219_v40 = vrot.slane %v2089_v51, %v2154_v11  ;;  %v4311_v48 = vsub.s32 3, %v3576_v45  ;;  %v4312_v37 = vsub.s32 5, %v3576_v45 }
 0x482   :  { %v2230_v13 = vsel %vm2229_vm15, %v2202_v39, %v2228_v49 }
 0x483   :  { %v2220_v5 = vsel %vm2156_vm10, %v2219_v40, %v2215_v21  ;;  %v2232_v62 = vsel %vm2231_vm0, %v2211_v16, %v2230_v13 }
 0x484   :  { %v2234_v52 = vsel %vm2233_vm1, %v2220_v5, %v2232_v62 }
 0x49c   :  { %v2108_v15 = vpop.trf.xlu0 }
 0x49d   :  { %v2127_v43 = vrot.slane %v2108_v15, %v4307_v35 }
 0x49f   :  { %vm2128_vm3 = vcmp.lt.s32.totalorder %v3576_v45, %v2127_v43 }
 0x4a0   :  { %v2236_v18 = vsel %vm2128_vm3, %v2234_v52, -1e+30 }
 0x4a1   :  { %v2238_v6 = vsel %vm2237_vm2, %v2236_v18, -inf }
 0x4a2   :  { %v2239_v9 = vrot.slane %v2238_v6, 4 }
 0x4a4   :  { %v2240_v12 = vmax.f32 %v2238_v6, %v2239_v9 }
 0x4a6   :  { %v2241_v7 = vrot.slane %v2240_v12, 2 }
 0x4a8   :  { %v2242_v8 = vmax.f32 %v2240_v12, %v2241_v7 }
 0x4aa   :  { %v2243_v46 = vrot.slane %v2242_v8, 1 }
 0x4ac   :  { %v2244_v11 = vmax.f32 %v2242_v8, %v2243_v46 }
 0x4ae   :  { %v2245_v1 = vsub.f32 %v2236_v18, %v2244_v11 }
 0x4b0   :  { %v2246_v2 = vmul.f32 1.442695, %v2245_v1 }
 0x4b2   :  { %3101 = vpow2.f32 %v2246_v2 }
 0x4bf   :  { %v3102_v14 = vpop.eup %3101 }
 0x4c0   :  { %v2248_v3 = vsel %vm2237_vm2, %v3102_v14, 0.0 }
 0x4c1   :  { %v2249_v22 = vrot.slane %v2248_v3, 4 }
 0x4c3   :  { %v2250_v23 = vadd.f32 %v2249_v22, %v2248_v3 }
 0x4c5   :  { %v2251_v10 = vrot.slane %v2250_v23, 2 }
 0x4c7   :  { %v2252_v19 = vadd.f32 %v2251_v10, %v2250_v23 }
 0x4c9   :  { %v2253_v26 = vrot.slane %v2252_v19, 1 }
 0x4cb   :  { %v2254_v27 = vadd.f32 %v2253_v26, %v2252_v19 }
 0x4cd   :  { %3103 = vrcp.f32 %v2254_v27 }
 0x4da   :  { %v3104_v28 = vpop.eup %3103 }
 0x4db   :  { %v2256_v29 = vmul.f32 %v3104_v28, %v3102_v14 }
 0x4dd   :  { %2441 = vst.msk [vmem:[#allocation16] sm:$0xff] %vm2237_vm2, %v2256_v29  ;;  %v2304_v31 = vrot.slane %v2256_v29, %v4308_v30  ;;  %v2260_v32 = vrot.slane %v2256_v29, %v4307_v35  ;;  %v2271_v34 = vrot.slane %v2256_v29, %v4309_v33  ;;  %v2282_v38 = vrot.slane %v2256_v29, %v4310_v36 }
 0x4de   :  { %v2293_v42 = vrot.slane %v2256_v29, %v4311_v48  ;;  %v2315_v51 = vrot.slane %v2256_v29, %v4312_v37  ;;  %v2326_v49 = vrot.slane %v2256_v29, %v2325_v55  ;;  %v2337_v47 = vrot.slane %v2256_v29, %v2336_v58 }
 0x4df   :  { %2310 = vbcast.lane.b32.xlu0 %v2304_v31, 264  ;;  %2262 = vbcast.lane.b32.xlu1 %v2260_v32, 256 }
 0x4e3   :  { %2266 = vbcast.lane.b32.xlu1 %v2260_v32, 264 }
 0x4e7   :  { %2273 = vbcast.lane.b32.xlu1 %v2271_v34, 256 }
 0x4eb   :  { %2277 = vbcast.lane.b32.xlu1 %v2271_v34, 264 }
 0x4ef   :  { %2284 = vbcast.lane.b32.xlu1 %v2282_v38, 256 }
 0x4f3   :  { %2288 = vbcast.lane.b32.xlu1 %v2282_v38, 264 }
 0x4f7   :  { %2295 = vbcast.lane.b32.xlu1 %v2293_v42, 256 }
 0x4fb   :  { %2299 = vbcast.lane.b32.xlu1 %v2293_v42, 264 }
 0x4ff   :  { %2306 = vbcast.lane.b32.xlu1 %v2304_v31, 256 }
 0x503   :  { %2317 = vbcast.lane.b32.xlu1 %v2315_v51, 256 }
 0x507   :  { %2321 = vbcast.lane.b32.xlu1 %v2315_v51, 264 }
 0x50b   :  { %2328 = vbcast.lane.b32.xlu1 %v2326_v49, 256 }
 0x50f   :  { %2332 = vbcast.lane.b32.xlu1 %v2326_v49, 264 }
 0x510   :  { %3216 = shalt.err (!%p3213_p5)
}
 0x511   :  { %2463 = dma.vmem_to_hbm [thread:$0]  %s2461_s7, 128, %s4148_s12, [#allocation17]   ;;  %v2345_v15 = vunpack.c.l.bf16 %v3984_v59  ;;  %v2346_v35 = vunpack.c.h.bf16 %v3984_v59  ;;  %v2347_v43 = vunpack.c.l.bf16 %v3986_v61  ;;  %v2348_v52 = vunpack.c.h.bf16 %v3986_v61 }
 0x512   :  { %v2349_v18 = vunpack.c.l.bf16 %v3996_v50  ;;  %v2350_v6 = vunpack.c.h.bf16 %v3996_v50  ;;  %v2351_v9 = vunpack.c.l.bf16 %v3998_v54  ;;  %v2352_v12 = vunpack.c.h.bf16 %v3998_v54  ;;  %s3320_s12 = smov [#allocation15]  }
 0x513   :  { %2339 = vbcast.lane.b32.xlu1 %v2337_v47, 256  ;;  %v2353_v7 = vunpack.c.l.bf16 %v4012_v60  ;;  %v2354_v8 = vunpack.c.h.bf16 %v4012_v60  ;;  %v2355_v46 = vunpack.c.l.bf16 %v4014_v17  ;;  %v2356_v59 = vunpack.c.h.bf16 %v4014_v17  ;;  %s2447_s3 = sshll.u32 %s3320_s12, 4  ;;  %s2448_s3 = int_to_ptr.vmem [resolvable:$true] %s2447_s3 }
 0x514   :  { %v2357_v11 = vunpack.c.l.bf16 %v4028_v20  ;;  %v2358_v61 = vunpack.c.h.bf16 %v4028_v20  ;;  %v2359_v2 = vunpack.c.l.bf16 %v4030_v24  ;;  %v2360_v50 = vunpack.c.h.bf16 %v4030_v24  ;;  %s3225_s19 = scalar_lea.vmem %s2448_s3, 512  ;;  %p3230_p7 = scmp.lt.s32.totalorder %s2448_s3, %s2448_s3 }
 0x515   :  { %v2361_v14 = vunpack.c.l.bf16 %v3988_v63  ;;  %v2362_v54 = vunpack.c.h.bf16 %v3988_v63  ;;  %v2365_v60 = vunpack.c.l.bf16 %v4000_v53  ;;  %v2366_v23 = vunpack.c.h.bf16 %v4000_v53  ;;  %p3226_p6 = scmp.ne.s32.totalorder %s2448_s3, %s3225_s19  ;;  %p3231_p8 = scmp.lt.s32.totalorder %s3225_s19, %s3225_s19 }
 0x516   :  { %v2369_v19 = vunpack.c.l.bf16 %v4016_v56  ;;  %v2370_v20 = vunpack.c.h.bf16 %v4016_v56 }
 0x517   :  { %2343 = vbcast.lane.b32.xlu1 %v2337_v47, 264  ;;  %v2363_v47 = vunpack.c.l.bf16 %v3992_v44  ;;  %p3232_p9 = por %p3231_p8, %p3230_p7 }
 0x519   :  { %p3233_p10 = pnand %p3232_p9, %p3226_p6 }
 0x551   :  { %v2263_v39 = vpop.permute.xlu1 %2262 }
 0x552   :  { %v2377_v26 = vmul.f32 %v2345_v15, %v2263_v39  ;;  %v2378_v27 = vmul.f32 %v2346_v35, %v2263_v39  ;;  %v2364_v39 = vunpack.c.h.bf16 %v3992_v44  ;;  %v2371_v44 = vunpack.c.l.bf16 %v4018_v57 }
 0x555   :  { %v2267_v45 = vpop.permute.xlu1 %2266 }
 0x556   :  { %v2379_v30 = vmul.f32 %v2347_v43, %v2267_v45  ;;  %v2380_v31 = vmul.f32 %v2348_v52, %v2267_v45  ;;  %v2368_v52 = vunpack.c.h.bf16 %v4002_v41 }
 0x559   :  { %v2274_v40 = vpop.permute.xlu1 %2273 }
 0x55a   :  { %v2381_v3 = vmul.f32 %v2349_v18, %v2274_v40  ;;  %v2382_v22 = vmul.f32 %v2350_v6, %v2274_v40 }
 0x55c   :  { %v2409_v33 = vadd.f32 %v2381_v3, %v2377_v26  ;;  %v2416_v34 = vadd.f32 %v2382_v22, %v2378_v27 }
 0x55d   :  { %v2278_v0 = vpop.permute.xlu1 %2277 }
 0x55e   :  { %v2383_v17 = vmul.f32 %v2351_v9, %v2278_v0  ;;  %v2384_v10 = vmul.f32 %v2352_v12, %v2278_v0 }
 0x560   :  { %v2423_v53 = vadd.f32 %v2383_v17, %v2379_v30  ;;  %v2430_v48 = vadd.f32 %v2384_v10, %v2380_v31 }
 0x561   :  { %v2285_v13 = vpop.permute.xlu1 %2284 }
 0x562   :  { %v2385_v28 = vmul.f32 %v2353_v7, %v2285_v13  ;;  %v2386_v24 = vmul.f32 %v2354_v8, %v2285_v13  ;;  %v2372_v7 = vunpack.c.h.bf16 %v4018_v57  ;;  %v2373_v8 = vunpack.c.l.bf16 %v4032_v25 }
 0x564   :  { %v2410_v51 = vadd.f32 %v2409_v33, %v2385_v28  ;;  %v2417_v55 = vadd.f32 %v2416_v34, %v2386_v24 }
 0x565   :  { %v2289_v21 = vpop.permute.xlu1 %2288 }
 0x566   :  { %v2387_v63 = vmul.f32 %v2355_v46, %v2289_v21  ;;  %v2388_v32 = vmul.f32 %v2356_v59, %v2289_v21  ;;  %v2374_v46 = vunpack.c.h.bf16 %v4032_v25 }
 0x568   :  { %v2424_v45 = vadd.f32 %v2423_v53, %v2387_v63  ;;  %v2431_v40 = vadd.f32 %v2430_v48, %v2388_v32 }
 0x569   :  { %v2296_v16 = vpop.permute.xlu1 %2295 }
 0x56a   :  { %v2389_v36 = vmul.f32 %v2357_v11, %v2296_v16  ;;  %v2390_v38 = vmul.f32 %v2358_v61, %v2296_v16  ;;  %v2311_v16 = vpop.permute.xlu0 %2310 }
 0x56b   :  { %v2395_v59 = vmul.f32 %v2363_v47, %v2311_v16  ;;  %v2396_v11 = vmul.f32 %v2364_v39, %v2311_v16 }
 0x56c   :  { %v2411_v0 = vadd.f32 %v2410_v51, %v2389_v36  ;;  %v2418_v13 = vadd.f32 %v2417_v55, %v2390_v38 }
 0x56d   :  { %v2300_v5 = vpop.permute.xlu1 %2299 }
 0x56e   :  { %v2391_v42 = vmul.f32 %v2359_v2, %v2300_v5  ;;  %v2392_v37 = vmul.f32 %v2360_v50, %v2300_v5  ;;  %v2367_v5 = vunpack.c.l.bf16 %v4002_v41  ;;  %v2375_v41 = vunpack.c.l.bf16 %v4034_v4 }
 0x570   :  { %v2425_v35 = vadd.f32 %v2424_v45, %v2391_v42  ;;  %v2432_v43 = vadd.f32 %v2431_v40, %v2392_v37 }
 0x571   :  { %v2307_v62 = vpop.permute.xlu1 %2306 }
 0x572   :  { %v2393_v56 = vmul.f32 %v2361_v14, %v2307_v62  ;;  %v2394_v49 = vmul.f32 %v2362_v54, %v2307_v62  ;;  %v2376_v14 = vunpack.c.h.bf16 %v4034_v4  ;;  %v2426_v54 = vadd.f32 %v2425_v35, %v2395_v59 }
 0x573   :  { %v2433_v3 = vadd.f32 %v2432_v43, %v2396_v11 }
 0x574   :  { %v2412_v18 = vadd.f32 %v2411_v0, %v2393_v56  ;;  %v2419_v62 = vadd.f32 %v2418_v13, %v2394_v49 }
 0x575   :  { %v2318_v1 = vpop.permute.xlu1 %2317 }
 0x576   :  { %v2397_v21 = vmul.f32 %v2365_v60, %v2318_v1  ;;  %v2398_v15 = vmul.f32 %v2366_v23, %v2318_v1 }
 0x578   :  { %v2413_v61 = vadd.f32 %v2412_v18, %v2397_v21  ;;  %v2420_v1 = vadd.f32 %v2419_v62, %v2398_v15 }
 0x579   :  { %v2322_v29 = vpop.permute.xlu1 %2321 }
 0x57a   :  { %v2399_v2 = vmul.f32 %v2367_v5, %v2322_v29  ;;  %v2400_v50 = vmul.f32 %v2368_v52, %v2322_v29 }
 0x57c   :  { %v2427_v25 = vadd.f32 %v2426_v54, %v2399_v2 }
 0x57d   :  { %v2329_v58 = vpop.permute.xlu1 %2328 }
 0x57e   :  { %v2401_v6 = vmul.f32 %v2369_v19, %v2329_v58  ;;  %v2402_v9 = vmul.f32 %v2370_v20, %v2329_v58  ;;  %v2434_v20 = vadd.f32 %v2433_v3, %v2400_v50 }
 0x580   :  { %v2414_v22 = vadd.f32 %v2413_v61, %v2401_v6  ;;  %v2421_v60 = vadd.f32 %v2420_v1, %v2402_v9 }
 0x581   :  { %v2333_v12 = vpop.permute.xlu1 %2332 }
 0x582   :  { %v2403_v57 = vmul.f32 %v2371_v44, %v2333_v12  ;;  %v2404_v17 = vmul.f32 %v2372_v7, %v2333_v12 }
 0x584   :  { %v2428_v24 = vadd.f32 %v2427_v25, %v2403_v57  ;;  %v2435_v29 = vadd.f32 %v2434_v20, %v2404_v17 }
 0x585   :  { %v2340_v23 = vpop.permute.xlu1 %2339 }
 0x586   :  { %v2405_v10 = vmul.f32 %v2373_v8, %v2340_v23  ;;  %v2406_v19 = vmul.f32 %v2374_v46, %v2340_v23 }
 0x588   :  { %v2415_v26 = vadd.f32 %v2414_v22, %v2405_v10  ;;  %v2422_v27 = vadd.f32 %v2421_v60, %v2406_v19 }
 0x589   :  { %v2344_v28 = vpop.permute.xlu1 %2343 }
 0x58a   :  { %2437 = vst [vmem:[#allocation15] sm:$0xff] %v2415_v26  ;;  %2438 = vst [vmem:[#allocation15 + $0x8] sm:$0xff] %v2422_v27  ;;  %v2407_v4 = vmul.f32 %v2375_v41, %v2344_v28  ;;  %v2408_v30 = vmul.f32 %v2376_v14, %v2344_v28 }
 0x58c   :  { %v2429_v31 = vadd.f32 %v2428_v24, %v2407_v4  ;;  %v2436_v63 = vadd.f32 %v2435_v29, %v2408_v30 }
 0x58e   :  { %2439 = vst [vmem:[#allocation15 + $0x10] sm:$0xff] %v2429_v31  ;;  %2440 = vst [vmem:[#allocation15 + $0x18] sm:$0xff] %v2436_v63 }
 0x58f   :  { %3236 = shalt.err (!%p3233_p10)
}
 0x590   :  { %s3321_s20 = smov 256   ;;  %s3322_s21 = smov 16  }
 0x591   :  { %2453 = dma.vmem_to_hbm [thread:$0]  %s2448_s3, 512, %s4147_s11, [#allocation8], %s3321_s20, %s3321_s20, %s3322_s21  }
 0x592   :  { %3275 = dma.done.wait [#allocation8], 512  }
 0x593   :  { %3276 = vsyncadd [#allocation8], 4294966784 }
 0x594   :  { %3277 = dma.done.wait [#allocation17], 128  }
 0x595   :  { %3278 = vsyncadd [#allocation17], 4294967168 }
 0x596   :  { %2470 = vsyncpa [#allocation7], 1 }
 0x597   :  { %2471 = vsyncpa [#allocation10], 1 }
 0x598   :  { %2472 = vsyncpa [#allocation13], 1 }
 0x599   :  { %2473 = vsyncpa [#allocation8], 1 }
 0x59a   :  { %2474 = vsyncpa [#allocation17], 1 }

</bundles_post_ra>
